<compile_context>
chip_gen: v6e
topology: v6e:2x2x1
jax: 0.10.0
libtpu: 0.0.40
codegen_flags: <defaults>
</compile_context>

<pallas_src>
import jax
import jax.numpy as jnp
from jax import lax
from jax.experimental import pallas as pl
from jax.experimental.pallas import tpu as pltpu


LANE = 128
SUBLANE = 8


def _round_up(x, m):
    return ((x + m - 1) // m) * m


def _pad2(x, rows, cols):
    r, c = x.shape
    return jnp.pad(x, ((0, rows - r), (0, cols - c)))


# ------------------------------ fused Pallas kernel ------------------------------

def _make_gin_kernel(num_gin_layers, num_mlp_layers):
    """Builds the fully-fused GIN forward kernel for a static layer structure."""
    L = num_mlp_layers

    def kernel(*refs):
        adj_ref, s_ref, st_ref, invn_ref, h_ref, vecs_ref = refs[:6]
        w_refs = refs[6:6 + num_gin_layers * L]
        pred_w_ref, pred_b_ref, o_ref = refs[6 + num_gin_layers * L:]

        adj = adj_ref[...]        # (Np, Np) bf16, already holds A + (1+eps) I
        s = s_ref[...]            # (Bp, Np) f32 one-hot graph membership
        st = st_ref[...]          # (Np, Bp) f32 = S^T
        invn = invn_ref[...]      # (Bp, 1)  f32 = 1 / batch_num_nodes (1 in pad rows)
        vecs = vecs_ref[...]      # (R, Dh)  f32 packed small parameters
        h = h_ref[...]            # (Np, Din_p) f32

        dh = vecs.shape[1]

        def row(idx):             # (1, Dh) static-row slice of the packed params
            return vecs[idx:idx + 1, :]

        def graphnorm_relu(t, w, b, ms):
            # GraphNorm ('gn'): per-graph mean (scaled by mean_scale) / std,
            # affine, ReLU.  One stats matmul (K = N), variance by
            # E[t^2] - ms(2-ms) mean^2 at (B, D) in f32, rsqrt on the EUP,
            # one broadcast matmul (K = B), VPU finish.
            stats = jnp.dot(s, jnp.concatenate([t, t * t], axis=1),
                            preferred_element_type=jnp.float32) * invn
            mean = stats[:, :dh]
            ex2 = stats[:, dh:]
            var = jnp.maximum(ex2 - ms * (2.0 - ms) * mean * mean, 0.0)
            inv_std = lax.rsqrt(var + 1e-6)                       # (B, D)
            # NOTE: padded graph rows get inv_std ~ rsqrt(1e-6); harmless
            # because the corresponding St columns are all zero.
            bcast = jnp.dot(st, jnp.concatenate([ms * mean, inv_std], axis=1),
                            preferred_element_type=jnp.float32)   # (N, 2D)
            mean_b = bcast[:, :dh]
            inv_std_b = bcast[:, dh:]
            return jnp.maximum(w * (t - mean_b) * inv_std_b + b, 0.0)

        vi = 0
        for i in range(num_gin_layers):
            mlp_b = [row(vi + l) for l in range(L)]
            vi += L
            nw = [row(vi + l) for l in range(L - 1)]
            vi += L - 1
            nb = [row(vi + l) for l in range(L - 1)]
            vi += L - 1
            nms = [row(vi + l) for l in range(L - 1)]
            vi += L - 1
            aw, ab, ams = row(vi), row(vi + 1), row(vi + 2)
            vi += 3

            x = h
            # GINConv sum aggregation: (1+eps) h + A h == adj' @ h.
            # bf16 x bf16 MXU path, f32 accumulation (adj' is exact in bf16).
            t = jnp.dot(adj, h.astype(jnp.bfloat16),
                        preferred_element_type=jnp.float32)
            # MLP: (Linear -> GraphNorm -> ReLU) x (L-1) -> Linear   (f32)
            for l in range(L - 1):
                t = jnp.dot(t, w_refs[i * L + l][...],
                            preferred_element_type=jnp.float32) + mlp_b[l]
                t = graphnorm_relu(t, nw[l], nb[l], nms[l])
            t = jnp.dot(t, w_refs[i * L + L - 1][...],
                        preferred_element_type=jnp.float32) + mlp_b[L - 1]
            # ApplyNodeFunc: GraphNorm + ReLU
            h = graphnorm_relu(t, aw, ab, ams)
            if i != 0:
                h = h + x                                          # residual

        # SumPooling + prediction Linear.
        pooled = jnp.dot(s, h, preferred_element_type=jnp.float32)
        o_ref[...] = jnp.dot(pooled, pred_w_ref[...],
                             preferred_element_type=jnp.float32) + pred_b_ref[...]
        # TODO(synk): nn.Dropout(final_dropout) omitted — identity in eval mode.

    return kernel


def gin_forward(params, adj, s, st, invn, h, *, num_layers, num_mlp_layers,
                eps=0.0):
    num_gin_layers = num_layers - 1
    L = num_mlp_layers
    n, din = h.shape
    b = s.shape[0]
    hidden = params["gin_layers"][0]["mlp_w"][0].shape[1]
    dout = params["pred_w"].shape[1]

    n_p = _round_up(n, SUBLANE)
    din_p = _round_up(din, LANE)
    dh_p = _round_up(hidden, LANE)
    dout_p = _round_up(dout, LANE)
    b_p = _round_up(b, SUBLANE)

    # Fold (1 + eps) * I into the adjacency once; bf16 is exact for {0,1,1+eps}.
    # (Assumes the input adjacency carries no self-loops, matching the DGL
    #  copy_u/sum semantics of the reference model.)
    adj_eps = adj + (1.0 + eps) * jnp.eye(n, dtype=jnp.float32)
    adj_eps = _pad2(adj_eps, n_p, n_p).astype(jnp.bfloat16)

    # Lane/sublane-dense zero-padded layouts.  Padded node rows / graph rows
    # stay confined: their S / St entries are zero so they never leak into
    # real-graph statistics, aggregation, or pooling.
    s_p = _pad2(s, b_p, n_p)
    st_p = _pad2(st, n_p, b_p)
    invn_p = jnp.pad(invn, ((0, b_p - b), (0, 0)), constant_values=1.0)
    h_p = _pad2(h, n_p, din_p)

    # Pack every tiny (1, hidden) parameter into ONE stacked array (one DMA
    # descriptor instead of ~4*L*num_gin_layers 1x128 transfers).
    vec_rows = []
    for i in range(num_gin_layers):
        lp = params["gin_layers"][i]
        vec_rows += [lp["mlp_b"][l] for l in range(L)]
        vec_rows += [lp["mlp_norm_w"][l] for l in range(L - 1)]
        vec_rows += [lp["mlp_norm_b"][l] for l in range(L - 1)]
        vec_rows += [lp["mlp_norm_ms"][l] for l in range(L - 1)]
        vec_rows += [lp["apply_norm_w"], lp["apply_norm_b"], lp["apply_norm_ms"]]
    vecs = jnp.concatenate([_pad2(v, 1, dh_p) for v in vec_rows], axis=0)
    r_p = _round_up(vecs.shape[0], SUBLANE)
    vecs = jnp.pad(vecs, ((0, r_p - vecs.shape[0]), (0, 0)))

    inputs = [adj_eps, s_p, st_p, invn_p, h_p, vecs]
    for i in range(num_gin_layers):
        lp = params["gin_layers"][i]
        in_dim_p = din_p if i == 0 else dh_p
        dims_p = [in_dim_p] + [dh_p] * L
        for l in range(L):
            inputs.append(_pad2(lp["mlp_w"][l], dims_p[l], dims_p[l + 1]))
    inputs.append(_pad2(params["pred_w"], dh_p, dout_p))
    inputs.append(_pad2(params["pred_b"], 1, dout_p))

    # --- VMEM budget: every input is resident + a few NxD f32 intermediates.
    in_bytes = sum(int(a.size) * a.dtype.itemsize for a in inputs)
    out_bytes = b_p * dout_p * 4
    interm_bytes = 8 * n_p * 2 * max(din_p, dh_p) * 4
    needed = in_bytes + out_bytes + interm_bytes
    vmem_limit = int(min(100 * 2**20, max(int(needed * 1.25), 16 * 2**20)))

    # --- cost estimate (advisory, lets XLA schedule around the custom call).
    flops = 0
    for i in range(num_gin_layers):
        in_d = din_p if i == 0 else dh_p
        flops += 2 * n_p * n_p * in_d                      # aggregation
        dims_p = [in_d] + [dh_p] * L
        for l in range(L):
            flops += 2 * n_p * dims_p[l] * dims_p[l + 1]   # MLP linears
        flops += L * (2 * b_p * n_p * 2 * dh_p             # norm stats dots
                      + 2 * n_p * b_p * 2 * dh_p)          # norm broadcast dots
    flops += 2 * b_p * n_p * dh_p + 2 * b_p * dh_p * dout_p   # pool + pred
    transcendentals = num_gin_layers * L * b_p * dh_p          # rsqrt per norm
    cost = pl.CostEstimate(flops=int(flops),
                           transcendentals=int(transcendentals),
                           bytes_accessed=int(in_bytes + out_bytes))

    vmem = pl.BlockSpec(memory_space=pltpu.MemorySpace.VMEM)
    out_p = pl.pallas_call(
        _make_gin_kernel(num_gin_layers, L),
        out_shape=jax.ShapeDtypeStruct((b_p, dout_p), jnp.float32),
        in_specs=[vmem] * len(inputs),
        out_specs=vmem,
        compiler_params=pltpu.CompilerParams(vmem_limit_bytes=vmem_limit),
        cost_estimate=cost,
    )(*inputs)
    return out_p[:b, :dout]


# ------------------------------ parameter init ------------------------------

def _torch_linear_init(key, fan_in, fan_out):
    # Mimics torch.nn.Linear default init: U(-1/sqrt(fan_in), 1/sqrt(fan_in)).
    kw, kb = jax.random.split(key)
    bound = 1.0 / (fan_in ** 0.5)
    w = jax.random.uniform(kw, (fan_in, fan_out), jnp.float32, -bound, bound)
    b = jax.random.uniform(kb, (1, fan_out), jnp.float32, -bound, bound)
    return w, b


def init_gin_params(key, num_layers, num_mlp_layers, input_dim, hidden_dim,
                    output_dim):
    params = {"gin_layers": []}
    for layer in range(num_layers - 1):
        lin = input_dim if layer == 0 else hidden_dim
        dims = [lin] + [hidden_dim] * num_mlp_layers  # MLP output_dim == hidden_dim
        mlp_w, mlp_b, nw, nb, nms = [], [], [], [], []
        for l in range(num_mlp_layers):
            key, sub = jax.random.split(key)
            w, b = _torch_linear_init(sub, dims[l], dims[l + 1])
            mlp_w.append(w)
            mlp_b.append(b)
        for _ in range(num_mlp_layers - 1):
            nw.append(jnp.ones((1, hidden_dim), jnp.float32))
            nb.append(jnp.zeros((1, hidden_dim), jnp.float32))
            nms.append(jnp.ones((1, hidden_dim), jnp.float32))
        params["gin_layers"].append(dict(
            mlp_w=mlp_w, mlp_b=mlp_b,
            mlp_norm_w=nw, mlp_norm_b=nb, mlp_norm_ms=nms,
            apply_norm_w=jnp.ones((1, hidden_dim), jnp.float32),
            apply_norm_b=jnp.zeros((1, hidden_dim), jnp.float32),
            apply_norm_ms=jnp.ones((1, hidden_dim), jnp.float32),
        ))
    key, sub = jax.random.split(key)
    pw, pb = _torch_linear_init(sub, hidden_dim, output_dim)
    params["pred_w"] = pw
    params["pred_b"] = pb
    return params


# ------------------------------ pure-JAX reference ------------------------------

def _graphnorm_ref(h, seg_ids, counts, w, b, ms, relu):
    nb = counts.shape[0]
    mean = jax.ops.segment_sum(h, seg_ids, num_segments=nb) / counts
    sub = h - mean[seg_ids] * ms
    var = jax.ops.segment_sum(sub * sub, seg_ids, num_segments=nb) / counts
    std = jnp.sqrt(var + 1e-6)
    out = w * sub / std[seg_ids] + b
    return jnp.maximum(out, 0.0) if relu else out


def gin_forward_ref(params, adj, seg_ids, counts, h, num_layers,
                    num_mlp_layers, eps=0.0):
    for i in range(num_layers - 1):
        lp = params["gin_layers"][i]
        x = h
        t = (1.0 + eps) * h + adj @ h
        for l in range(num_mlp_layers - 1):
            t = t @ lp["mlp_w"][l] + lp["mlp_b"][l]
            t = _graphnorm_ref(t, seg_ids, counts, lp["mlp_norm_w"][l],
                               lp["mlp_norm_b"][l], lp["mlp_norm_ms"][l], True)
        t = t @ lp["mlp_w"][-1] + lp["mlp_b"][-1]
        t = _graphnorm_ref(t, seg_ids, counts, lp["apply_norm_w"],
                           lp["apply_norm_b"], lp["apply_norm_ms"], True)
        h = t
        if i != 0:
            h = h + x
    pooled = jax.ops.segment_sum(h, seg_ids, num_segments=counts.shape[0])
    return pooled @ params["pred_w"] + params["pred_b"]


# ---------------------------------- driver ----------------------------------

if __name__ == "__main__":
    num_layers = 3        # -> 2 GINConv layers
    num_mlp_layers = 2
    input_dim = 16
    hidden_dim = 32
    output_dim = 8
    nodes_per_graph = 8
    num_graphs = 2
    N = nodes_per_graph * num_graphs

    key = jax.random.PRNGKey(0)
    k_feat, k_adj, k_param = jax.random.split(key, 3)

    # node features
    h0 = jax.random.normal(k_feat, (N, input_dim), jnp.float32)

    # block-diagonal undirected adjacency (no self loops), 2 graphs of 8 nodes
    adj = jnp.zeros((N, N), jnp.float32)
    for g in range(num_graphs):
        k_adj, sub = jax.random.split(k_adj)
        u = (jax.random.uniform(sub, (nodes_per_graph, nodes_per_graph)) < 0.4)
        u = jnp.triu(u.astype(jnp.float32), k=1)
        a = u + u.T
        lo = g * nodes_per_graph
        adj = adj.at[lo:lo + nodes_per_graph, lo:lo + nodes_per_graph].set(a)

    # graph membership: one-hot [B, N], its transpose, and 1 / batch_num_nodes
    seg_ids = jnp.repeat(jnp.arange(num_graphs), nodes_per_graph)
    s = jax.nn.one_hot(seg_ids, num_graphs, dtype=jnp.float32).T   # (B, N)
    st = s.T                                                       # (N, B)
    counts = jnp.full((num_graphs, 1), float(nodes_per_graph), jnp.float32)
    invn = 1.0 / counts

    params = init_gin_params(k_param, num_layers, num_mlp_layers,
                             input_dim, hidden_dim, output_dim)

    out = gin_forward(params, adj, s, st, invn, h0,
                      num_layers=num_layers, num_mlp_layers=num_mlp_layers)
    out = jax.block_until_ready(out)
    assert out.shape == (num_graphs, output_dim)

    ref = gin_forward_ref(params, adj, seg_ids, counts, h0,
                          num_layers, num_mlp_layers)
    ref = jax.block_until_ready(ref)

    # The aggregation matmul runs on the bf16 MXU path (f32 accumulate), so
    # compare with a scale-aware max-norm tolerance against the f32 reference.
    err = float(jnp.max(jnp.abs(out - ref)))
    scale = float(jnp.max(jnp.abs(ref)))
    assert err <= 1e-2 * max(scale, 1.0), (err, scale, out, ref)

    print("KERNEL_OK")
</pallas_src>

<mosaic_0001>
module attributes {stable_mosaic.version = 11 : i64} {
  func.func @kernel(%arg0: memref<16x16xbf16, #tpu.memory_space<vmem>>, %arg1: memref<8x16xf32, #tpu.memory_space<vmem>>, %arg2: memref<16x8xf32, #tpu.memory_space<vmem>>, %arg3: memref<8x1xf32, #tpu.memory_space<vmem>>, %arg4: memref<16x128xf32, #tpu.memory_space<vmem>>, %arg5: memref<16x128xf32, #tpu.memory_space<vmem>>, %arg6: memref<128x128xf32, #tpu.memory_space<vmem>>, %arg7: memref<128x128xf32, #tpu.memory_space<vmem>>, %arg8: memref<128x128xf32, #tpu.memory_space<vmem>>, %arg9: memref<128x128xf32, #tpu.memory_space<vmem>>, %arg10: memref<128x128xf32, #tpu.memory_space<vmem>>, %arg11: memref<1x128xf32, #tpu.memory_space<vmem>>, %arg12: memref<8x128xf32, #tpu.memory_space<vmem>>) attributes {dimension_semantics = [], scalar_prefetch = 0 : i64, scratch_operands = 0 : i64, tpu.core_type = #tpu.core_type<tc>} {
    %c0 = arith.constant 0 : index
    %c0_0 = arith.constant 0 : index
    %0 = vector.load %arg0[%c0, %c0_0] : memref<16x16xbf16, #tpu.memory_space<vmem>>, vector<16x16xbf16>
    %c0_1 = arith.constant 0 : index
    %c0_2 = arith.constant 0 : index
    %1 = vector.load %arg1[%c0_1, %c0_2] : memref<8x16xf32, #tpu.memory_space<vmem>>, vector<8x16xf32>
    %c0_3 = arith.constant 0 : index
    %c0_4 = arith.constant 0 : index
    %2 = vector.load %arg2[%c0_3, %c0_4] : memref<16x8xf32, #tpu.memory_space<vmem>>, vector<16x8xf32>
    %c0_5 = arith.constant 0 : index
    %c0_6 = arith.constant 0 : index
    %3 = vector.load %arg3[%c0_5, %c0_6] : memref<8x1xf32, #tpu.memory_space<vmem>>, vector<8x1xf32>
    %c0_7 = arith.constant 0 : index
    %c0_8 = arith.constant 0 : index
    %4 = vector.load %arg5[%c0_7, %c0_8] : memref<16x128xf32, #tpu.memory_space<vmem>>, vector<16x128xf32>
    %c0_9 = arith.constant 0 : index
    %c0_10 = arith.constant 0 : index
    %5 = vector.load %arg4[%c0_9, %c0_10] : memref<16x128xf32, #tpu.memory_space<vmem>>, vector<16x128xf32>
    %6 = vector.extract_strided_slice %4 {offsets = [0, 0], sizes = [1, 128], strides = [1, 1]} : vector<16x128xf32> to vector<1x128xf32>
    %7 = vector.extract_strided_slice %4 {offsets = [1, 0], sizes = [1, 128], strides = [1, 1]} : vector<16x128xf32> to vector<1x128xf32>
    %8 = vector.extract_strided_slice %4 {offsets = [2, 0], sizes = [1, 128], strides = [1, 1]} : vector<16x128xf32> to vector<1x128xf32>
    %9 = vector.extract_strided_slice %4 {offsets = [3, 0], sizes = [1, 128], strides = [1, 1]} : vector<16x128xf32> to vector<1x128xf32>
    %10 = vector.extract_strided_slice %4 {offsets = [4, 0], sizes = [1, 128], strides = [1, 1]} : vector<16x128xf32> to vector<1x128xf32>
    %11 = vector.extract_strided_slice %4 {offsets = [5, 0], sizes = [1, 128], strides = [1, 1]} : vector<16x128xf32> to vector<1x128xf32>
    %12 = vector.extract_strided_slice %4 {offsets = [6, 0], sizes = [1, 128], strides = [1, 1]} : vector<16x128xf32> to vector<1x128xf32>
    %13 = vector.extract_strided_slice %4 {offsets = [7, 0], sizes = [1, 128], strides = [1, 1]} : vector<16x128xf32> to vector<1x128xf32>
    %14 = arith.truncf %5 : vector<16x128xf32> to vector<16x128xbf16>
    %cst = arith.constant dense<0.000000e+00> : vector<16x128xf32>
    %15 = tpu.matmul %0, %14, %cst {dimension_numbers = #tpu.dot_dimension_numbers<[1], [0], [0], [1], [0, 0, 1, 1], [], []>} : vector<16x16xbf16>, vector<16x128xbf16>, vector<16x128xf32> -> vector<16x128xf32>
    %c0_11 = arith.constant 0 : index
    %c0_12 = arith.constant 0 : index
    %16 = vector.load %arg6[%c0_11, %c0_12] : memref<128x128xf32, #tpu.memory_space<vmem>>, vector<128x128xf32>
    %cst_13 = arith.constant dense<0.000000e+00> : vector<16x128xf32>
    %17 = tpu.matmul %15, %16, %cst_13 {dimension_numbers = #tpu.dot_dimension_numbers<[1], [0], [0], [1], [0, 0, 1, 1], [], []>} : vector<16x128xf32>, vector<128x128xf32>, vector<16x128xf32> -> vector<16x128xf32>
    %18 = vector.broadcast %6 : vector<1x128xf32> to vector<16x128xf32>
    %19 = arith.addf %17, %18 : vector<16x128xf32>
    %20 = arith.mulf %19, %19 : vector<16x128xf32>
    %21 = tpu.concatenate %19, %20 in 1 : vector<16x128xf32>, vector<16x128xf32> -> vector<16x256xf32>
    %cst_14 = arith.constant dense<0.000000e+00> : vector<8x256xf32>
    %22 = tpu.matmul %1, %21, %cst_14 {dimension_numbers = #tpu.dot_dimension_numbers<[1], [0], [0], [1], [0, 0, 1, 1], [], []>} : vector<8x16xf32>, vector<16x256xf32>, vector<8x256xf32> -> vector<8x256xf32>
    %23 = vector.broadcast %3 : vector<8x1xf32> to vector<8x256xf32>
    %24 = arith.mulf %22, %23 : vector<8x256xf32>
    %25 = vector.extract_strided_slice %24 {offsets = [0, 0], sizes = [8, 128], strides = [1, 1]} : vector<8x256xf32> to vector<8x128xf32>
    %26 = vector.extract_strided_slice %24 {offsets = [0, 128], sizes = [8, 128], strides = [1, 1]} : vector<8x256xf32> to vector<8x128xf32>
    %cst_15 = arith.constant 2.000000e+00 : f32
    %27 = vector.broadcast %cst_15 : f32 to vector<1x128xf32>
    %28 = arith.subf %27, %10 : vector<1x128xf32>
    %29 = arith.mulf %10, %28 : vector<1x128xf32>
    %30 = vector.broadcast %29 : vector<1x128xf32> to vector<8x128xf32>
    %31 = arith.mulf %30, %25 : vector<8x128xf32>
    %32 = arith.mulf %31, %25 : vector<8x128xf32>
    %33 = arith.subf %26, %32 : vector<8x128xf32>
    %cst_16 = arith.constant 0.000000e+00 : f32
    %34 = vector.broadcast %cst_16 : f32 to vector<8x128xf32>
    %35 = arith.maximumf %33, %34 : vector<8x128xf32>
    %cst_17 = arith.constant 9.99999997E-7 : f32
    %36 = vector.broadcast %cst_17 : f32 to vector<8x128xf32>
    %37 = arith.addf %35, %36 : vector<8x128xf32>
    %38 = math.rsqrt %37 : vector<8x128xf32>
    %39 = vector.broadcast %10 : vector<1x128xf32> to vector<8x128xf32>
    %40 = arith.mulf %39, %25 : vector<8x128xf32>
    %41 = tpu.concatenate %40, %38 in 1 : vector<8x128xf32>, vector<8x128xf32> -> vector<8x256xf32>
    %cst_18 = arith.constant dense<0.000000e+00> : vector<16x256xf32>
    %42 = tpu.matmul %2, %41, %cst_18 {dimension_numbers = #tpu.dot_dimension_numbers<[1], [0], [0], [1], [0, 0, 1, 1], [], []>} : vector<16x8xf32>, vector<8x256xf32>, vector<16x256xf32> -> vector<16x256xf32>
    %43 = vector.extract_strided_slice %42 {offsets = [0, 0], sizes = [16, 128], strides = [1, 1]} : vector<16x256xf32> to vector<16x128xf32>
    %44 = vector.extract_strided_slice %42 {offsets = [0, 128], sizes = [16, 128], strides = [1, 1]} : vector<16x256xf32> to vector<16x128xf32>
    %45 = arith.subf %19, %43 : vector<16x128xf32>
    %46 = vector.broadcast %8 : vector<1x128xf32> to vector<16x128xf32>
    %47 = arith.mulf %46, %45 : vector<16x128xf32>
    %48 = arith.mulf %47, %44 : vector<16x128xf32>
    %49 = vector.broadcast %9 : vector<1x128xf32> to vector<16x128xf32>
    %50 = arith.addf %48, %49 : vector<16x128xf32>
    %cst_19 = arith.constant 0.000000e+00 : f32
    %51 = vector.broadcast %cst_19 : f32 to vector<16x128xf32>
    %52 = arith.maximumf %50, %51 : vector<16x128xf32>
    %c0_20 = arith.constant 0 : index
    %c0_21 = arith.constant 0 : index
    %53 = vector.load %arg7[%c0_20, %c0_21] : memref<128x128xf32, #tpu.memory_space<vmem>>, vector<128x128xf32>
    %cst_22 = arith.constant dense<0.000000e+00> : vector<16x128xf32>
    %54 = tpu.matmul %52, %53, %cst_22 {dimension_numbers = #tpu.dot_dimension_numbers<[1], [0], [0], [1], [0, 0, 1, 1], [], []>} : vector<16x128xf32>, vector<128x128xf32>, vector<16x128xf32> -> vector<16x128xf32>
    %55 = vector.broadcast %7 : vector<1x128xf32> to vector<16x128xf32>
    %56 = arith.addf %54, %55 : vector<16x128xf32>
    %57 = arith.mulf %56, %56 : vector<16x128xf32>
    %58 = tpu.concatenate %56, %57 in 1 : vector<16x128xf32>, vector<16x128xf32> -> vector<16x256xf32>
    %cst_23 = arith.constant dense<0.000000e+00> : vector<8x256xf32>
    %59 = tpu.matmul %1, %58, %cst_23 {dimension_numbers = #tpu.dot_dimension_numbers<[1], [0], [0], [1], [0, 0, 1, 1], [], []>} : vector<8x16xf32>, vector<16x256xf32>, vector<8x256xf32> -> vector<8x256xf32>
    %60 = vector.broadcast %3 : vector<8x1xf32> to vector<8x256xf32>
    %61 = arith.mulf %59, %60 : vector<8x256xf32>
    %62 = vector.extract_strided_slice %61 {offsets = [0, 0], sizes = [8, 128], strides = [1, 1]} : vector<8x256xf32> to vector<8x128xf32>
    %63 = vector.extract_strided_slice %61 {offsets = [0, 128], sizes = [8, 128], strides = [1, 1]} : vector<8x256xf32> to vector<8x128xf32>
    %cst_24 = arith.constant 2.000000e+00 : f32
    %64 = vector.broadcast %cst_24 : f32 to vector<1x128xf32>
    %65 = arith.subf %64, %13 : vector<1x128xf32>
    %66 = arith.mulf %13, %65 : vector<1x128xf32>
    %67 = vector.broadcast %66 : vector<1x128xf32> to vector<8x128xf32>
    %68 = arith.mulf %67, %62 : vector<8x128xf32>
    %69 = arith.mulf %68, %62 : vector<8x128xf32>
    %70 = arith.subf %63, %69 : vector<8x128xf32>
    %cst_25 = arith.constant 0.000000e+00 : f32
    %71 = vector.broadcast %cst_25 : f32 to vector<8x128xf32>
    %72 = arith.maximumf %70, %71 : vector<8x128xf32>
    %cst_26 = arith.constant 9.99999997E-7 : f32
    %73 = vector.broadcast %cst_26 : f32 to vector<8x128xf32>
    %74 = arith.addf %72, %73 : vector<8x128xf32>
    %75 = math.rsqrt %74 : vector<8x128xf32>
    %76 = vector.broadcast %13 : vector<1x128xf32> to vector<8x128xf32>
    %77 = arith.mulf %76, %62 : vector<8x128xf32>
    %78 = tpu.concatenate %77, %75 in 1 : vector<8x128xf32>, vector<8x128xf32> -> vector<8x256xf32>
    %cst_27 = arith.constant dense<0.000000e+00> : vector<16x256xf32>
    %79 = tpu.matmul %2, %78, %cst_27 {dimension_numbers = #tpu.dot_dimension_numbers<[1], [0], [0], [1], [0, 0, 1, 1], [], []>} : vector<16x8xf32>, vector<8x256xf32>, vector<16x256xf32> -> vector<16x256xf32>
    %80 = vector.extract_strided_slice %79 {offsets = [0, 0], sizes = [16, 128], strides = [1, 1]} : vector<16x256xf32> to vector<16x128xf32>
    %81 = vector.extract_strided_slice %79 {offsets = [0, 128], sizes = [16, 128], strides = [1, 1]} : vector<16x256xf32> to vector<16x128xf32>
    %82 = arith.subf %56, %80 : vector<16x128xf32>
    %83 = vector.broadcast %11 : vector<1x128xf32> to vector<16x128xf32>
    %84 = arith.mulf %83, %82 : vector<16x128xf32>
    %85 = arith.mulf %84, %81 : vector<16x128xf32>
    %86 = vector.broadcast %12 : vector<1x128xf32> to vector<16x128xf32>
    %87 = arith.addf %85, %86 : vector<16x128xf32>
    %cst_28 = arith.constant 0.000000e+00 : f32
    %88 = vector.broadcast %cst_28 : f32 to vector<16x128xf32>
    %89 = arith.maximumf %87, %88 : vector<16x128xf32>
    %90 = vector.extract_strided_slice %4 {offsets = [8, 0], sizes = [1, 128], strides = [1, 1]} : vector<16x128xf32> to vector<1x128xf32>
    %91 = vector.extract_strided_slice %4 {offsets = [9, 0], sizes = [1, 128], strides = [1, 1]} : vector<16x128xf32> to vector<1x128xf32>
    %92 = vector.extract_strided_slice %4 {offsets = [10, 0], sizes = [1, 128], strides = [1, 1]} : vector<16x128xf32> to vector<1x128xf32>
    %93 = vector.extract_strided_slice %4 {offsets = [11, 0], sizes = [1, 128], strides = [1, 1]} : vector<16x128xf32> to vector<1x128xf32>
    %94 = vector.extract_strided_slice %4 {offsets = [12, 0], sizes = [1, 128], strides = [1, 1]} : vector<16x128xf32> to vector<1x128xf32>
    %95 = vector.extract_strided_slice %4 {offsets = [13, 0], sizes = [1, 128], strides = [1, 1]} : vector<16x128xf32> to vector<1x128xf32>
    %96 = vector.extract_strided_slice %4 {offsets = [14, 0], sizes = [1, 128], strides = [1, 1]} : vector<16x128xf32> to vector<1x128xf32>
    %97 = vector.extract_strided_slice %4 {offsets = [15, 0], sizes = [1, 128], strides = [1, 1]} : vector<16x128xf32> to vector<1x128xf32>
    %98 = arith.truncf %89 : vector<16x128xf32> to vector<16x128xbf16>
    %cst_29 = arith.constant dense<0.000000e+00> : vector<16x128xf32>
    %99 = tpu.matmul %0, %98, %cst_29 {dimension_numbers = #tpu.dot_dimension_numbers<[1], [0], [0], [1], [0, 0, 1, 1], [], []>} : vector<16x16xbf16>, vector<16x128xbf16>, vector<16x128xf32> -> vector<16x128xf32>
    %c0_30 = arith.constant 0 : index
    %c0_31 = arith.constant 0 : index
    %100 = vector.load %arg8[%c0_30, %c0_31] : memref<128x128xf32, #tpu.memory_space<vmem>>, vector<128x128xf32>
    %cst_32 = arith.constant dense<0.000000e+00> : vector<16x128xf32>
    %101 = tpu.matmul %99, %100, %cst_32 {dimension_numbers = #tpu.dot_dimension_numbers<[1], [0], [0], [1], [0, 0, 1, 1], [], []>} : vector<16x128xf32>, vector<128x128xf32>, vector<16x128xf32> -> vector<16x128xf32>
    %102 = vector.broadcast %90 : vector<1x128xf32> to vector<16x128xf32>
    %103 = arith.addf %101, %102 : vector<16x128xf32>
    %104 = arith.mulf %103, %103 : vector<16x128xf32>
    %105 = tpu.concatenate %103, %104 in 1 : vector<16x128xf32>, vector<16x128xf32> -> vector<16x256xf32>
    %cst_33 = arith.constant dense<0.000000e+00> : vector<8x256xf32>
    %106 = tpu.matmul %1, %105, %cst_33 {dimension_numbers = #tpu.dot_dimension_numbers<[1], [0], [0], [1], [0, 0, 1, 1], [], []>} : vector<8x16xf32>, vector<16x256xf32>, vector<8x256xf32> -> vector<8x256xf32>
    %107 = vector.broadcast %3 : vector<8x1xf32> to vector<8x256xf32>
    %108 = arith.mulf %106, %107 : vector<8x256xf32>
    %109 = vector.extract_strided_slice %108 {offsets = [0, 0], sizes = [8, 128], strides = [1, 1]} : vector<8x256xf32> to vector<8x128xf32>
    %110 = vector.extract_strided_slice %108 {offsets = [0, 128], sizes = [8, 128], strides = [1, 1]} : vector<8x256xf32> to vector<8x128xf32>
    %cst_34 = arith.constant 2.000000e+00 : f32
    %111 = vector.broadcast %cst_34 : f32 to vector<1x128xf32>
    %112 = arith.subf %111, %94 : vector<1x128xf32>
    %113 = arith.mulf %94, %112 : vector<1x128xf32>
    %114 = vector.broadcast %113 : vector<1x128xf32> to vector<8x128xf32>
    %115 = arith.mulf %114, %109 : vector<8x128xf32>
    %116 = arith.mulf %115, %109 : vector<8x128xf32>
    %117 = arith.subf %110, %116 : vector<8x128xf32>
    %cst_35 = arith.constant 0.000000e+00 : f32
    %118 = vector.broadcast %cst_35 : f32 to vector<8x128xf32>
    %119 = arith.maximumf %117, %118 : vector<8x128xf32>
    %cst_36 = arith.constant 9.99999997E-7 : f32
    %120 = vector.broadcast %cst_36 : f32 to vector<8x128xf32>
    %121 = arith.addf %119, %120 : vector<8x128xf32>
    %122 = math.rsqrt %121 : vector<8x128xf32>
    %123 = vector.broadcast %94 : vector<1x128xf32> to vector<8x128xf32>
    %124 = arith.mulf %123, %109 : vector<8x128xf32>
    %125 = tpu.concatenate %124, %122 in 1 : vector<8x128xf32>, vector<8x128xf32> -> vector<8x256xf32>
    %cst_37 = arith.constant dense<0.000000e+00> : vector<16x256xf32>
    %126 = tpu.matmul %2, %125, %cst_37 {dimension_numbers = #tpu.dot_dimension_numbers<[1], [0], [0], [1], [0, 0, 1, 1], [], []>} : vector<16x8xf32>, vector<8x256xf32>, vector<16x256xf32> -> vector<16x256xf32>
    %127 = vector.extract_strided_slice %126 {offsets = [0, 0], sizes = [16, 128], strides = [1, 1]} : vector<16x256xf32> to vector<16x128xf32>
    %128 = vector.extract_strided_slice %126 {offsets = [0, 128], sizes = [16, 128], strides = [1, 1]} : vector<16x256xf32> to vector<16x128xf32>
    %129 = arith.subf %103, %127 : vector<16x128xf32>
    %130 = vector.broadcast %92 : vector<1x128xf32> to vector<16x128xf32>
    %131 = arith.mulf %130, %129 : vector<16x128xf32>
    %132 = arith.mulf %131, %128 : vector<16x128xf32>
    %133 = vector.broadcast %93 : vector<1x128xf32> to vector<16x128xf32>
    %134 = arith.addf %132, %133 : vector<16x128xf32>
    %cst_38 = arith.constant 0.000000e+00 : f32
    %135 = vector.broadcast %cst_38 : f32 to vector<16x128xf32>
    %136 = arith.maximumf %134, %135 : vector<16x128xf32>
    %c0_39 = arith.constant 0 : index
    %c0_40 = arith.constant 0 : index
    %137 = vector.load %arg9[%c0_39, %c0_40] : memref<128x128xf32, #tpu.memory_space<vmem>>, vector<128x128xf32>
    %cst_41 = arith.constant dense<0.000000e+00> : vector<16x128xf32>
    %138 = tpu.matmul %136, %137, %cst_41 {dimension_numbers = #tpu.dot_dimension_numbers<[1], [0], [0], [1], [0, 0, 1, 1], [], []>} : vector<16x128xf32>, vector<128x128xf32>, vector<16x128xf32> -> vector<16x128xf32>
    %139 = vector.broadcast %91 : vector<1x128xf32> to vector<16x128xf32>
    %140 = arith.addf %138, %139 : vector<16x128xf32>
    %141 = arith.mulf %140, %140 : vector<16x128xf32>
    %142 = tpu.concatenate %140, %141 in 1 : vector<16x128xf32>, vector<16x128xf32> -> vector<16x256xf32>
    %cst_42 = arith.constant dense<0.000000e+00> : vector<8x256xf32>
    %143 = tpu.matmul %1, %142, %cst_42 {dimension_numbers = #tpu.dot_dimension_numbers<[1], [0], [0], [1], [0, 0, 1, 1], [], []>} : vector<8x16xf32>, vector<16x256xf32>, vector<8x256xf32> -> vector<8x256xf32>
    %144 = vector.broadcast %3 : vector<8x1xf32> to vector<8x256xf32>
    %145 = arith.mulf %143, %144 : vector<8x256xf32>
    %146 = vector.extract_strided_slice %145 {offsets = [0, 0], sizes = [8, 128], strides = [1, 1]} : vector<8x256xf32> to vector<8x128xf32>
    %147 = vector.extract_strided_slice %145 {offsets = [0, 128], sizes = [8, 128], strides = [1, 1]} : vector<8x256xf32> to vector<8x128xf32>
    %cst_43 = arith.constant 2.000000e+00 : f32
    %148 = vector.broadcast %cst_43 : f32 to vector<1x128xf32>
    %149 = arith.subf %148, %97 : vector<1x128xf32>
    %150 = arith.mulf %97, %149 : vector<1x128xf32>
    %151 = vector.broadcast %150 : vector<1x128xf32> to vector<8x128xf32>
    %152 = arith.mulf %151, %146 : vector<8x128xf32>
    %153 = arith.mulf %152, %146 : vector<8x128xf32>
    %154 = arith.subf %147, %153 : vector<8x128xf32>
    %cst_44 = arith.constant 0.000000e+00 : f32
    %155 = vector.broadcast %cst_44 : f32 to vector<8x128xf32>
    %156 = arith.maximumf %154, %155 : vector<8x128xf32>
    %cst_45 = arith.constant 9.99999997E-7 : f32
    %157 = vector.broadcast %cst_45 : f32 to vector<8x128xf32>
    %158 = arith.addf %156, %157 : vector<8x128xf32>
    %159 = math.rsqrt %158 : vector<8x128xf32>
    %160 = vector.broadcast %97 : vector<1x128xf32> to vector<8x128xf32>
    %161 = arith.mulf %160, %146 : vector<8x128xf32>
    %162 = tpu.concatenate %161, %159 in 1 : vector<8x128xf32>, vector<8x128xf32> -> vector<8x256xf32>
    %cst_46 = arith.constant dense<0.000000e+00> : vector<16x256xf32>
    %163 = tpu.matmul %2, %162, %cst_46 {dimension_numbers = #tpu.dot_dimension_numbers<[1], [0], [0], [1], [0, 0, 1, 1], [], []>} : vector<16x8xf32>, vector<8x256xf32>, vector<16x256xf32> -> vector<16x256xf32>
    %164 = vector.extract_strided_slice %163 {offsets = [0, 0], sizes = [16, 128], strides = [1, 1]} : vector<16x256xf32> to vector<16x128xf32>
    %165 = vector.extract_strided_slice %163 {offsets = [0, 128], sizes = [16, 128], strides = [1, 1]} : vector<16x256xf32> to vector<16x128xf32>
    %166 = arith.subf %140, %164 : vector<16x128xf32>
    %167 = vector.broadcast %95 : vector<1x128xf32> to vector<16x128xf32>
    %168 = arith.mulf %167, %166 : vector<16x128xf32>
    %169 = arith.mulf %168, %165 : vector<16x128xf32>
    %170 = vector.broadcast %96 : vector<1x128xf32> to vector<16x128xf32>
    %171 = arith.addf %169, %170 : vector<16x128xf32>
    %cst_47 = arith.constant 0.000000e+00 : f32
    %172 = vector.broadcast %cst_47 : f32 to vector<16x128xf32>
    %173 = arith.maximumf %171, %172 : vector<16x128xf32>
    %174 = arith.addf %173, %89 : vector<16x128xf32>
    %cst_48 = arith.constant dense<0.000000e+00> : vector<8x128xf32>
    %175 = tpu.matmul %1, %174, %cst_48 {dimension_numbers = #tpu.dot_dimension_numbers<[1], [0], [0], [1], [0, 0, 1, 1], [], []>} : vector<8x16xf32>, vector<16x128xf32>, vector<8x128xf32> -> vector<8x128xf32>
    %c0_49 = arith.constant 0 : index
    %c0_50 = arith.constant 0 : index
    %176 = vector.load %arg10[%c0_49, %c0_50] : memref<128x128xf32, #tpu.memory_space<vmem>>, vector<128x128xf32>
    %cst_51 = arith.constant dense<0.000000e+00> : vector<8x128xf32>
    %177 = tpu.matmul %175, %176, %cst_51 {dimension_numbers = #tpu.dot_dimension_numbers<[1], [0], [0], [1], [0, 0, 1, 1], [], []>} : vector<8x128xf32>, vector<128x128xf32>, vector<8x128xf32> -> vector<8x128xf32>
    %c0_52 = arith.constant 0 : index
    %c0_53 = arith.constant 0 : index
    %178 = vector.load %arg11[%c0_52, %c0_53] : memref<1x128xf32, #tpu.memory_space<vmem>>, vector<1x128xf32>
    %179 = vector.broadcast %178 : vector<1x128xf32> to vector<8x128xf32>
    %180 = arith.addf %177, %179 : vector<8x128xf32>
    %c0_54 = arith.constant 0 : index
    %c0_55 = arith.constant 0 : index
    %181 = vector.load %arg12[%c0_54, %c0_55] : memref<8x128xf32, #tpu.memory_space<vmem>>, vector<8x128xf32>
    tpu.vector_store %arg12[%c0_54, %c0_55], %180 {strides = array<i32>} : memref<8x128xf32, #tpu.memory_space<vmem>>, vector<8x128xf32>,
    return
  }
}

</mosaic_0001>

<bundles_post_ra>
// kernel: tpu_custom_call.1
= control target key start
LH: loop header
LB: loop body
LE: loop exit
PB: predicated region body
PF: predicated region fallthrough
CT: control target
= control target key end

     0   :  { %17 = vsyncpa [#allocation3], 0  ;;  %s2423_s0 = inlined_call_operand.hbm [shape: bf16[16,16], index: 0, kind: input, shape index: {}]   ;;  %s2424_s1 = inlined_call_operand.hbm [shape: f32[8,16], index: 1, kind: input, shape index: {}]   ;;  %s2425_s2 = inlined_call_operand.vmem [shape: f32[16,8], index: 2, kind: input, shape index: {}]   ;;  %s2426_s3 = inlined_call_operand.vmem [shape: f32[8,1], index: 3, kind: input, shape index: {}]   ;;  %s2427_s4 = inlined_call_operand.vmem [shape: f32[16,128], index: 4, kind: input, shape index: {}]   ;;  %s2428_s5 = inlined_call_operand.vmem [shape: f32[16,128], index: 5, kind: input, shape index: {}]   ;;  %s2429_s6 = inlined_call_operand.hbm [shape: f32[128,128], index: 6, kind: input, shape index: {}]   ;;  %s2430_s7 = inlined_call_operand.hbm [shape: f32[128,128], index: 7, kind: input, shape index: {}]   ;;  %s2431_s8 = inlined_call_operand.hbm [shape: f32[128,128], index: 8, kind: input, shape index: {}]   ;;  %s2432_s9 = inlined_call_operand.hbm [shape: f32[128,128], index: 9, kind: input, shape index: {}]   ;;  %s2433_s10 = inlined_call_operand.hbm [shape: f32[128,128], index: 10, kind: input, shape index: {}]   ;;  %s2434_s11 = inlined_call_operand.vmem [shape: f32[1,128], index: 11, kind: input, shape index: {}]   ;;  %s2435_s12 = inlined_call_operand.hbm [shape: f32[8,128], index: 12, kind: output, shape index: {}]  }
   0x1   :  { %18 = vsyncpa [#allocation6], 0 }
   0x2   :  { %19 = vsyncpa [#allocation9], 0 }
   0x3   :  { %20 = vsyncpa [#allocation12], 0 }
   0x4   :  { %21 = vsyncpa [#allocation4], 0  ;;  %s2064_s21 = smov [#allocation5]  }
   0x5   :  { %s40_s22 = sshll.u32 %s2064_s21, 4  ;;  %s41_s22 = int_to_ptr.vmem [resolvable:$true] %s40_s22 }
   0x6   :  { %s1902_s23 = scalar_lea.vmem %s41_s22, 128  ;;  %p1907_p1 = scmp.lt.s32.totalorder %s41_s22, %s41_s22 }
   0x7   :  { %p1903_p0 = scmp.ne.s32.totalorder %s41_s22, %s1902_s23  ;;  %p1908_p2 = scmp.lt.s32.totalorder %s1902_s23, %s1902_s23 }
   0x9   :  { %p1909_p3 = por %p1908_p2, %p1907_p1 }
   0xb   :  { %p1910_p4 = pnand %p1909_p3, %p1903_p0 }
   0xd   :  { %1913 = shalt.err (!%p1910_p4)
}
   0xe   :  { %43 = dma.hbm_to_vmem [thread:$0]  %s2424_s1, 128, %s41_s22, [#allocation6]  }
   0xf   :  { %s2065_s26 = smov [#allocation8]   ;;  %s2066_s28 = smov [#allocation11]  }
  0x10   :  { %s69_s27 = sshll.u32 %s2065_s26, 4  ;;  %s93_s29 = sshll.u32 %s2066_s28, 4  ;;  %s70_s27 = int_to_ptr.vmem [resolvable:$true] %s69_s27  ;;  %s94_s29 = int_to_ptr.vmem [resolvable:$true] %s93_s29 }
  0x11   :  { %s1922_s30 = scalar_lea.vmem %s70_s27, 2048  ;;  %p1927_p6 = scmp.lt.s32.totalorder %s70_s27, %s70_s27 }
  0x12   :  { %p1923_p5 = scmp.ne.s32.totalorder %s70_s27, %s1922_s30  ;;  %p1928_p7 = scmp.lt.s32.totalorder %s1922_s30, %s1922_s30 }
  0x14   :  { %p1929_p8 = por %p1928_p7, %p1927_p6 }
  0x16   :  { %p1930_p9 = pnand %p1929_p8, %p1923_p5 }
  0x18   :  { %1933 = shalt.err (!%p1930_p9)
}
  0x19   :  { %s2067_s13 = smov 128   ;;  %s2068_s14 = smov 8  }
  0x1a   :  { %75 = dma.hbm_to_vmem [thread:$0]  %s2430_s7, 2048, %s70_s27, [#allocation9], %s2067_s13, %s2067_s13, %s2068_s14  }
  0x1b   :  { %s1942_s1 = scalar_lea.vmem %s94_s29, 2048  ;;  %p1947_p11 = scmp.lt.s32.totalorder %s94_s29, %s94_s29 }
  0x1c   :  { %p1943_p10 = scmp.ne.s32.totalorder %s94_s29, %s1942_s1  ;;  %p1948_p12 = scmp.lt.s32.totalorder %s1942_s1, %s1942_s1 }
  0x1e   :  { %p1949_p13 = por %p1948_p12, %p1947_p11 }
  0x20   :  { %p1950_p0 = pnand %p1949_p13, %p1943_p10 }
  0x22   :  { %1953 = shalt.err (!%p1950_p0)
}
  0x23   :  { %99 = dma.hbm_to_vmem [thread:$0]  %s2432_s9, 2048, %s94_s29, [#allocation12], %s2067_s13, %s2067_s13, %s2068_s14  }
  0x24   :  { %s2069_s19 = smov [#allocation2]  }
  0x25   :  { %s27_s20 = sshll.u32 %s2069_s19, 4  ;;  %s28_s20 = int_to_ptr.vmem [resolvable:$true] %s27_s20 }
  0x26   :  { %s1962_s21 = scalar_lea.vmem %s28_s20, 128  ;;  %p1967_p2 = scmp.lt.s32.totalorder %s28_s20, %s28_s20 }
  0x27   :  { %p1963_p1 = scmp.ne.s32.totalorder %s28_s20, %s1962_s21  ;;  %p1968_p3 = scmp.lt.s32.totalorder %s1962_s21, %s1962_s21 }
  0x29   :  { %p1969_p4 = por %p1968_p3, %p1967_p2 }
  0x2b   :  { %p1970_p5 = pnand %p1969_p4, %p1963_p1 }
  0x2d   :  { %1973 = shalt.err (!%p1970_p5)
}
  0x2e   :  { %s2070_s7 = smov 64   ;;  %s2071_s22 = smov 4  }
  0x2f   :  { %33 = dma.hbm_to_vmem [thread:$0]  %s2423_s0, 128, %s28_s20, [#allocation3], %s2070_s7, %s2070_s7, %s2071_s22  }
  0x30   :  { %s2072_s25 = smov [#allocation7]   ;;  %s2073_s27 = smov [#allocation10]  }
  0x31   :  { %s57_s26 = sshll.u32 %s2072_s25, 4  ;;  %s81_s9 = sshll.u32 %s2073_s27, 4  ;;  %s58_s26 = int_to_ptr.vmem [resolvable:$true] %s57_s26  ;;  %s82_s9 = int_to_ptr.vmem [resolvable:$true] %s81_s9 }
  0x32   :  { %s1982_s28 = scalar_lea.vmem %s58_s26, 2048  ;;  %p1987_p7 = scmp.lt.s32.totalorder %s58_s26, %s58_s26 }
  0x33   :  { %p1983_p6 = scmp.ne.s32.totalorder %s58_s26, %s1982_s28  ;;  %p1988_p8 = scmp.lt.s32.totalorder %s1982_s28, %s1982_s28 }
  0x35   :  { %p1989_p9 = por %p1988_p8, %p1987_p7 }
  0x37   :  { %p1990_p10 = pnand %p1989_p9, %p1983_p6 }
  0x39   :  { %1993 = shalt.err (!%p1990_p10)
}
  0x3a   :  { %63 = dma.hbm_to_vmem [thread:$0]  %s2429_s6, 2048, %s58_s26, [#allocation6], %s2067_s13, %s2067_s13, %s2068_s14  }
  0x3b   :  { %s2002_s0 = scalar_lea.vmem %s82_s9, 2048  ;;  %p2007_p12 = scmp.lt.s32.totalorder %s82_s9, %s82_s9 }
  0x3c   :  { %p2003_p11 = scmp.ne.s32.totalorder %s82_s9, %s2002_s0  ;;  %p2008_p13 = scmp.lt.s32.totalorder %s2002_s0, %s2002_s0 }
  0x3e   :  { %p2009_p0 = por %p2008_p13, %p2007_p12 }
  0x40   :  { %p2010_p1 = pnand %p2009_p0, %p2003_p11 }
  0x42   :  { %2013 = shalt.err (!%p2010_p1)
}
  0x43   :  { %87 = dma.hbm_to_vmem [thread:$0]  %s2431_s8, 2048, %s82_s9, [#allocation9], %s2067_s13, %s2067_s13, %s2068_s14  }
  0x44   :  { %s2074_s1 = smov [#allocation13]  }
  0x45   :  { %s105_s17 = sshll.u32 %s2074_s1, 4  ;;  %s106_s17 = int_to_ptr.vmem [resolvable:$true] %s105_s17 }
  0x46   :  { %s2022_s18 = scalar_lea.vmem %s106_s17, 2048  ;;  %p2027_p3 = scmp.lt.s32.totalorder %s106_s17, %s106_s17 }
  0x47   :  { %p2023_p2 = scmp.ne.s32.totalorder %s106_s17, %s2022_s18  ;;  %p2028_p4 = scmp.lt.s32.totalorder %s2022_s18, %s2022_s18 }
  0x49   :  { %p2029_p5 = por %p2028_p4, %p2027_p3 }
  0x4b   :  { %p2030_p6 = pnand %p2029_p5, %p2023_p2 }
  0x4d   :  { %2033 = shalt.err (!%p2030_p6)
}
  0x4e   :  { %111 = dma.hbm_to_vmem [thread:$0]  %s2433_s10, 2048, %s106_s17, [#allocation12], %s2067_s13, %s2067_s13, %s2068_s14  }
  0x4f   :  { %2054 = dma.done.wait [#allocation3], 128  }
  0x50   :  { %2055 = vsyncadd [#allocation3], 4294967168 }
  0x51   :  { %2056 = dma.done.wait [#allocation6], 2176  }
  0x52   :  { %2057 = vsyncadd [#allocation6], 4294965120 }
  0x53   :  { %2058 = dma.done.wait [#allocation9], 4096  }
  0x54   :  { %2059 = vsyncadd [#allocation9], 4294963200 }
  0x55   :  { %2060 = dma.done.wait [#allocation12], 4096  }
  0x56   :  { %2061 = vsyncadd [#allocation12], 4294963200  ;;  %v2075_v0 = vmov 0.0   ;;  %vm2076_vm0 = vmmov 0   ;;  %v144_v1 = vld [vmem:[%s2427_s4] sm:$0xff]  ;;  %v145_v2 = vld [vmem:[%s2427_s4 + $0x8] sm:$0xff]  ;;  %v213_v27 = vlaneseq }
  0x57   :  { %1675 = vmatprep.subr.bf16.mxu0 %v2075_v0  ;;  %1677 = vmatprep.mubr.msk.bf16.mxu0 %vm2076_vm0, %v2075_v0  ;;  %v146_v3 = vpack.c.bf16 %v145_v2, %v144_v1  ;;  %v212_v4 = vld [vmem:[#allocation7 + $0x78] sm:$0xff]  ;;  %v2189_v5 = vld [vmem:[#allocation2] sm:$0xff]   ;;  %vm152_vm1 = vcmask 130048   ;;  %v210_v7 = vld [vmem:[#allocation7 + $0x68] sm:$0xff]  ;;  %v2077_v26 = vmov 0   ;;  %vm392_vm2 = vcmask 64512  }
  0x58   :  { %1681 = vmatprep.subr.mxu1 %v212_v4  ;;  %v211_v6 = vld [vmem:[#allocation7 + $0x70] sm:$0xff]  ;;  %v209_v8 = vld [vmem:[#allocation7 + $0x60] sm:$0xff]  ;;  %v208_v9 = vld [vmem:[#allocation7 + $0x58] sm:$0xff]  ;;  %1884 = vset.pattern.permute.xlu0 %v2077_v26  ;;  %v2198_v28 = vshrl.u32 %v213_v27, 7  ;;  %s2078_s27 = smov [#allocation14]  }
  0x59   :  { %1676 = vmatpush3.bf16.msra.mxu0 %v146_v3  ;;  %1682 = vmatpush3.msra.mxu1 %v212_v4  ;;  %v207_v10 = vld [vmem:[#allocation7 + $0x50] sm:$0xff]  ;;  %v206_v11 = vld [vmem:[#allocation7 + $0x48] sm:$0xff]  ;;  %v205_v12 = vld [vmem:[#allocation7 + $0x40] sm:$0xff]  ;;  %s1550_s9 = sshll.u32 %s2078_s27, 4  ;;  %s1551_s9 = int_to_ptr.vmem [resolvable:$true] %s1550_s9 }
  0x5a   :  { %1683 = vmatprep.subr.mxu1 %v211_v6  ;;  %v204_v13 = vld [vmem:[#allocation7 + $0x38] sm:$0xff]  ;;  %v203_v14 = vld [vmem:[#allocation7 + $0x30] sm:$0xff]  ;;  %v202_v15 = vld [vmem:[#allocation7 + $0x28] sm:$0xff]  ;;  %v215_v29 = vsub.s32 0, %v2198_v28  ;;  %v2229_v41 = vsub.s32 4, %v2198_v28  ;;  %s2034_s28 = scalar_lea.vmem %s1551_s9, 128  ;;  %p2039_p8 = scmp.lt.s32.totalorder %s1551_s9, %s1551_s9 }
  0x5b   :  { %1684 = vmatpush3.msra.mxu1 %v211_v6  ;;  %v201_v16 = vld [vmem:[#allocation7 + $0x20] sm:$0xff]  ;;  %v200_v17 = vld [vmem:[#allocation7 + $0x18] sm:$0xff]  ;;  %v199_v18 = vld [vmem:[#allocation7 + $0x10] sm:$0xff]  ;;  %p2035_p7 = scmp.ne.s32.totalorder %s1551_s9, %s2034_s28  ;;  %p2040_p9 = scmp.lt.s32.totalorder %s2034_s28, %s2034_s28 }
  0x5c   :  { %1678 = vmatmul.mubr.msk.bf16.vlgmr.msra.gmra.mxu0 %vm152_vm1, %v2189_v5  ;;  %1685 = vmatprep.subr.mxu1 %v210_v7  ;;  %v198_v19 = vld [vmem:[#allocation7 + $0x8] sm:$0xff]  ;;  %v197_v20 = vld [vmem:[#allocation7] sm:$0xff]  ;;  %v141_v25 = vld [vmem:[%s2426_s3] sm:$0xff] }
  0x5d   :  { %1686 = vmatpush3.msra.mxu1 %v210_v7  ;;  %361 = vmatprep.mubr.f32.mxu0 %v2075_v0  ;;  %v2204_v30 = vld [vmem:[%s2428_s5] sm:$0xff]  ;;  %v2218_v38 = vld [vmem:[#allocation5] sm:$0xff]  ;;  %v507_v60 = vld [vmem:[#allocation8 + $0x68] sm:$0xff]  ;;  %p2041_p10 = por %p2040_p9, %p2039_p8 }
  0x5e   :  { %1687 = vmatprep.subr.mxu1 %v209_v8  ;;  %370 = vperm.xlu0 %1884, %v141_v25   ;;  %v216_v31 = vrot.slane %v2204_v30, %v215_v29  ;;  %v375_v39 = vsub.f32 2.0, %v2204_v30  ;;  %v390_v53 = vrot.slane %v2204_v30, %v2229_v41  ;;  %v2242_v56 = vld [vmem:[%s2425_s2] sm:$0xff]  ;;  %v509_v57 = vld [vmem:[#allocation8 + $0x78] sm:$0xff]  ;;  %v506_v61 = vld [vmem:[#allocation8 + $0x60] sm:$0xff] }
  0x5f   :  { %1688 = vmatpush3.msra.mxu1 %v209_v8  ;;  %v508_v58 = vld [vmem:[#allocation8 + $0x70] sm:$0xff]  ;;  %v2250_v59 = vld [vmem:[%s2425_s2 + $0x8] sm:$0xff]  ;;  %v503_v1 = vld [vmem:[#allocation8 + $0x48] sm:$0xff]  ;;  %p2042_p11 = pnand %p2041_p10, %p2035_p7 }
  0x60   :  { %1689 = vmatprep.subr.mxu1 %v208_v9  ;;  %v2226_v40 = vmul.f32 %v375_v39, %v2204_v30  ;;  %v505_v62 = vld [vmem:[#allocation8 + $0x58] sm:$0xff]  ;;  %v504_v63 = vld [vmem:[#allocation8 + $0x50] sm:$0xff]  ;;  %v502_v2 = vld [vmem:[#allocation8 + $0x40] sm:$0xff] }
  0x61   :  { %1690 = vmatpush3.msra.mxu1 %v208_v9  ;;  %v501_v3 = vld [vmem:[#allocation8 + $0x38] sm:$0xff]  ;;  %v500_v4 = vld [vmem:[#allocation8 + $0x30] sm:$0xff]  ;;  %v499_v6 = vld [vmem:[#allocation8 + $0x28] sm:$0xff] }
  0x62   :  { %1691 = vmatprep.subr.mxu1 %v207_v10  ;;  %v380_v43 = vrot.slane %v2226_v40, %v2229_v41  ;;  %v498_v7 = vld [vmem:[#allocation8 + $0x20] sm:$0xff]  ;;  %v497_v8 = vld [vmem:[#allocation8 + $0x18] sm:$0xff]  ;;  %v496_v9 = vld [vmem:[#allocation8 + $0x10] sm:$0xff] }
  0x63   :  { %1692 = vmatpush3.msra.mxu1 %v207_v10  ;;  %v495_v10 = vld [vmem:[#allocation8 + $0x8] sm:$0xff] }
  0x64   :  { %1693 = vmatprep.subr.mxu1 %v206_v11 }
  0x65   :  { %1694 = vmatpush3.msra.mxu1 %v206_v11  ;;  %v494_v11 = vld [vmem:[#allocation8] sm:$0xff] }
  0x66   :  { %1695 = vmatprep.subr.mxu1 %v205_v12 }
  0x67   :  { %1696 = vmatpush3.msra.mxu1 %v205_v12  ;;  %v480_v12 = vsub.s32 2, %v2198_v28 }
  0x68   :  { %1697 = vmatprep.subr.mxu1 %v204_v13 }
  0x69   :  { %1698 = vmatpush3.msra.mxu1 %v204_v13  ;;  %v481_v13 = vrot.slane %v2204_v30, %v480_v12 }
  0x6a   :  { %1699 = vmatprep.subr.mxu1 %v203_v14 }
  0x6b   :  { %1700 = vmatpush3.msra.mxu1 %v203_v14  ;;  %v488_v14 = vsub.s32 3, %v2198_v28 }
  0x6c   :  { %1701 = vmatprep.subr.mxu1 %v202_v15 }
  0x6d   :  { %1702 = vmatpush3.msra.mxu1 %v202_v15 }
  0x6e   :  { %1703 = vmatprep.subr.mxu1 %v201_v16 }
  0x6f   :  { %1704 = vmatpush3.msra.mxu1 %v201_v16 }
  0x70   :  { %1705 = vmatprep.subr.mxu1 %v200_v17 }
  0x71   :  { %1706 = vmatpush3.msra.mxu1 %v200_v17 }
  0x72   :  { %1707 = vmatprep.subr.mxu1 %v199_v18 }
  0x73   :  { %1708 = vmatpush3.msra.mxu1 %v199_v18 }
  0x74   :  { %1709 = vmatprep.subr.mxu1 %v198_v19 }
  0x75   :  { %1710 = vmatpush3.msra.mxu1 %v198_v19  ;;  %v489_v19 = vrot.slane %v2204_v30, %v488_v14 }
  0x76   :  { %1711 = vmatprep.subr.mxu1 %v197_v20 }
  0x77   :  { %1712 = vmatpush3.msra.mxu1 %v197_v20 }
  0xd9   :  { %v2231_v42 = vpop.permute.xlu0 %370 }
 0x11c   :  { %v190_v21 = vpop.f32.mrf.mxu0 }
 0x11d   :  { %1713 = vmatprep.mubr.f32.mxu1 %v190_v21 }
 0x11e   :  { %v1679_v22 = vpop.f32.mrf.mxu0 }
 0x120   :  { %v193_v23 = vpop.f32.mrf.mxu0 }
 0x121   :  { %1714 = vmatmul.mubr.f32.vlgmr.msra.gmra.mxu1 %v193_v23 }
 0x122   :  { %v1680_v24 = vpop.f32.mrf.mxu0  ;;  %655 = vmatprep.mubr.f32.mxu1 %v2075_v0 }
 0x1e1   :  { %v1715_v32 = vpop.f32.mrf.mxu1 }
 0x1e2   :  { %v2209_v33 = vadd.f32 %v1715_v32, %v216_v31 }
 0x1e3   :  { %v283_v34 = vpop.f32.mrf.mxu1 }
 0x1e4   :  { %v2211_v35 = vadd.f32 %v283_v34, %v216_v31  ;;  %v293_v36 = vmul.f32 %v2209_v33, %v2209_v33  ;;  %v512_v34 = vsub.s32 1, %v2198_v28 }
 0x1e6   :  { %325 = vmatprep.subr.mxu0 %v293_v36  ;;  %v292_v37 = vmul.f32 %v2211_v35, %v2211_v35 }
 0x1e7   :  { %326 = vmatpush1.msra.mxu0 %v2209_v33 }
 0x1e8   :  { %327 = vmatprep.subr.mxu0 %v292_v37 }
 0x1e9   :  { %328 = vmatpush1.msra.mxu0 %v2211_v35 }
 0x1ea   :  { %1564 = vmatmul.mubr.msk.f32.vlgmr.msra.gmra.mxu0 %vm152_vm1, %v2218_v38 }
 0x1eb   :  { %463 = vmatprep.mubr.f32.mxu0 %v2075_v0 }
 0x2aa   :  { %v363_v44 = vpop.f32.mrf.mxu0 }
 0x2ab   :  { %v373_v45 = vmul.f32 %v2231_v42, %v363_v44 }
 0x2ac   :  { %v365_v46 = vpop.f32.mrf.mxu0 }
 0x2ad   :  { %v381_v47 = vmul.f32 %v380_v43, %v373_v45  ;;  %v374_v48 = vmul.f32 %v2231_v42, %v365_v46  ;;  %v391_v55 = vmul.f32 %v390_v53, %v373_v45 }
 0x2af   :  { %v382_v49 = vmul.f32 %v381_v47, %v373_v45  ;;  %v2273_v45 = vsub.s32 7, %v2198_v28 }
 0x2b1   :  { %v383_v50 = vsub.f32 %v374_v48, %v382_v49  ;;  %v667_v46 = vrot.slane %v2226_v40, %v2273_v45  ;;  %v760_v40 = vsub.s32 5, %v2198_v28 }
 0x2b3   :  { %v384_v51 = vmax.f32 %v383_v50, 0.0 }
 0x2b5   :  { %v385_v52 = vadd.f32 1e-06, %v384_v51 }
 0x2b7   :  { %1886 = vrsqrt.f32 %v385_v52 }
 0x2c4   :  { %v1887_v54 = vpop.eup %1886 }
 0x2c5   :  { %429 = vmatprep.subr.mxu0 %v1887_v54 }
 0x2c6   :  { %430 = vmatpush1.msra.mxu0 %v391_v55 }
 0x2c7   :  { %1565 = vmatmul.mubr.msk.f32.vlgmr.msra.gmra.mxu0 %vm392_vm2, %v2242_v56  ;;  %1716 = vmatprep.subr.mxu0 %v509_v57 }
 0x2c8   :  { %469 = vmatprep.mubr.f32.mxu0 %v2075_v0  ;;  %1717 = vmatpush3.msra.mxu0 %v509_v57  ;;  %v677_v57 = vrot.slane %v2204_v30, %v2273_v45 }
 0x2c9   :  { %1718 = vmatprep.subr.mxu0 %v508_v58 }
 0x2ca   :  { %1719 = vmatpush3.msra.mxu0 %v508_v58 }
 0x2cb   :  { %1566 = vmatmul.mubr.msk.f32.gmra.mxu0 %vm392_vm2, %v2250_v59  ;;  %1720 = vmatprep.subr.mxu0 %v507_v60 }
 0x2cc   :  { %1721 = vmatpush3.msra.mxu0 %v507_v60 }
 0x2cd   :  { %1722 = vmatprep.subr.mxu0 %v506_v61 }
 0x2ce   :  { %1723 = vmatpush3.msra.mxu0 %v506_v61  ;;  %v761_v61 = vrot.slane %v2204_v30, %v760_v40 }
 0x2cf   :  { %1724 = vmatprep.subr.mxu0 %v505_v62 }
 0x2d0   :  { %1725 = vmatpush3.msra.mxu0 %v505_v62 }
 0x2d1   :  { %1726 = vmatprep.subr.mxu0 %v504_v63 }
 0x2d2   :  { %1727 = vmatpush3.msra.mxu0 %v504_v63 }
 0x2d3   :  { %1728 = vmatprep.subr.mxu0 %v503_v1 }
 0x2d4   :  { %1729 = vmatpush3.msra.mxu0 %v503_v1  ;;  %v768_v1 = vsub.s32 6, %v2198_v28  ;;  %v1450_v28 = vld [vmem:[#allocation13] sm:$0xff] }
 0x2d5   :  { %1730 = vmatprep.subr.mxu0 %v502_v2 }
 0x2d6   :  { %1731 = vmatpush3.msra.mxu0 %v502_v2 }
 0x2d7   :  { %1732 = vmatprep.subr.mxu0 %v501_v3 }
 0x2d8   :  { %1733 = vmatpush3.msra.mxu0 %v501_v3 }
 0x2d9   :  { %1734 = vmatprep.subr.mxu0 %v500_v4 }
 0x2da   :  { %1735 = vmatpush3.msra.mxu0 %v500_v4 }
 0x2db   :  { %1736 = vmatprep.subr.mxu0 %v499_v6 }
 0x2dc   :  { %1737 = vmatpush3.msra.mxu0 %v499_v6 }
 0x2dd   :  { %1738 = vmatprep.subr.mxu0 %v498_v7 }
 0x2de   :  { %1739 = vmatpush3.msra.mxu0 %v498_v7  ;;  %v769_v7 = vrot.slane %v2204_v30, %v768_v1 }
 0x2df   :  { %1740 = vmatprep.subr.mxu0 %v497_v8 }
 0x2e0   :  { %1741 = vmatpush3.msra.mxu0 %v497_v8 }
 0x2e1   :  { %1742 = vmatprep.subr.mxu0 %v496_v9 }
 0x2e2   :  { %1743 = vmatpush3.msra.mxu0 %v496_v9 }
 0x2e3   :  { %1744 = vmatprep.subr.mxu0 %v495_v10 }
 0x2e4   :  { %1745 = vmatpush3.msra.mxu0 %v495_v10 }
 0x2e5   :  { %1746 = vmatprep.subr.mxu0 %v494_v11 }
 0x2e6   :  { %1747 = vmatpush3.msra.mxu0 %v494_v11 }
 0x387   :  { %v465_v15 = vpop.f32.mrf.mxu0 }
 0x388   :  { %v476_v16 = vsub.f32 %v2211_v35, %v465_v15  ;;  %v513_v35 = vrot.slane %v2204_v30, %v512_v34  ;;  %v830_v30 = vld [vmem:[#allocation10 + $0x70] sm:$0xff] }
 0x389   :  { %v467_v17 = vpop.f32.mrf.mxu0 }
 0x38a   :  { %v482_v18 = vmul.f32 %v481_v13, %v476_v16 }
 0x38b   :  { %v471_v20 = vpop.f32.mrf.mxu0 }
 0x38c   :  { %v484_v21 = vmul.f32 %v482_v18, %v467_v17  ;;  %v477_v22 = vsub.f32 %v2209_v33, %v471_v20  ;;  %v829_v20 = vld [vmem:[#allocation10 + $0x68] sm:$0xff] }
 0x38d   :  { %v473_v25 = vpop.f32.mrf.mxu0 }
 0x38e   :  { %v490_v23 = vadd.f32 %v489_v19, %v484_v21  ;;  %v483_v24 = vmul.f32 %v481_v13, %v477_v22  ;;  %v828_v21 = vld [vmem:[#allocation10 + $0x60] sm:$0xff]  ;;  %v827_v22 = vld [vmem:[#allocation10 + $0x58] sm:$0xff] }
 0x390   :  { %v492_v26 = vmax.f32 %v490_v23, 0.0  ;;  %v485_v27 = vmul.f32 %v483_v24, %v473_v25  ;;  %v826_v23 = vld [vmem:[#allocation10 + $0x50] sm:$0xff]  ;;  %v825_v24 = vld [vmem:[#allocation10 + $0x48] sm:$0xff]  ;;  %v824_v25 = vld [vmem:[#allocation10 + $0x40] sm:$0xff] }
 0x392   :  { %v491_v31 = vadd.f32 %v489_v19, %v485_v27  ;;  %1748 = vmatprep.mubr.f32.mxu0 %v492_v26  ;;  %v831_v19 = vld [vmem:[#allocation10 + $0x78] sm:$0xff]  ;;  %v822_v26 = vld [vmem:[#allocation10 + $0x30] sm:$0xff]  ;;  %v821_v27 = vld [vmem:[#allocation10 + $0x28] sm:$0xff] }
 0x394   :  { %v493_v32 = vmax.f32 %v491_v31, 0.0  ;;  %v820_v31 = vld [vmem:[#allocation10 + $0x20] sm:$0xff] }
 0x396   :  { %1749 = vmatmul.mubr.f32.vlgmr.msra.gmra.mxu0 %v493_v32  ;;  %v819_v32 = vld [vmem:[#allocation10 + $0x18] sm:$0xff] }
 0x397   :  { %743 = vmatprep.mubr.f32.mxu0 %v2075_v0 }
 0x456   :  { %v1750_v36 = vpop.f32.mrf.mxu0 }
 0x457   :  { %v586_v37 = vadd.f32 %v1750_v36, %v513_v35  ;;  %v817_v36 = vld [vmem:[#allocation10 + $0x8] sm:$0xff] }
 0x458   :  { %v580_v33 = vpop.f32.mrf.mxu0 }
 0x459   :  { %v581_v39 = vadd.f32 %v580_v33, %v513_v35  ;;  %v590_v43 = vmul.f32 %v586_v37, %v586_v37  ;;  %v818_v35 = vld [vmem:[#allocation10 + $0x10] sm:$0xff] }
 0x45b   :  { %619 = vmatprep.subr.mxu1 %v590_v43  ;;  %v589_v44 = vmul.f32 %v581_v39, %v581_v39 }
 0x45c   :  { %620 = vmatpush1.msra.mxu1 %v586_v37 }
 0x45d   :  { %621 = vmatprep.subr.mxu1 %v589_v44 }
 0x45e   :  { %622 = vmatpush1.msra.mxu1 %v581_v39 }
 0x45f   :  { %1567 = vmatmul.mubr.msk.f32.vlgmr.msra.gmra.mxu1 %vm152_vm1, %v2218_v38 }
 0x460   :  { %977 = vmatprep.mubr.f32.mxu1 %v2075_v0 }
 0x51f   :  { %v657_v47 = vpop.f32.mrf.mxu1 }
 0x520   :  { %v662_v48 = vmul.f32 %v657_v47, %v2231_v42 }
 0x521   :  { %v659_v49 = vpop.f32.mrf.mxu1 }
 0x522   :  { %v668_v50 = vmul.f32 %v667_v46, %v662_v48  ;;  %v663_v51 = vmul.f32 %v659_v49, %v2231_v42  ;;  %v678_v60 = vmul.f32 %v677_v57, %v662_v48  ;;  %v2313_v46 = vld [vmem:[%s2428_s5 + $0x8] sm:$0xff] }
 0x523   :  { %v835_v47 = vrot.slane %v2313_v46, %v215_v29  ;;  %v986_v29 = vsub.f32 2.0, %v2313_v46 }
 0x524   :  { %v669_v52 = vmul.f32 %v668_v50, %v662_v48 }
 0x526   :  { %v670_v53 = vsub.f32 %v663_v51, %v669_v52 }
 0x528   :  { %v671_v54 = vmax.f32 %v670_v53, 0.0 }
 0x52a   :  { %v672_v55 = vadd.f32 1e-06, %v671_v54  ;;  %v2333_v54 = vmul.f32 %v986_v29, %v2313_v46 }
 0x52c   :  { %1888 = vrsqrt.f32 %v672_v55  ;;  %v991_v55 = vrot.slane %v2333_v54, %v2229_v41 }
 0x539   :  { %v1889_v58 = vpop.eup %1888 }
 0x53a   :  { %709 = vmatprep.subr.mxu0 %v1889_v58 }
 0x53b   :  { %710 = vmatpush1.msra.mxu0 %v678_v60 }
 0x53c   :  { %1568 = vmatmul.mubr.msk.f32.vlgmr.msra.gmra.mxu0 %vm392_vm2, %v2242_v56  ;;  %1751 = vmatprep.subr.bf16.mxu0 %v2075_v0 }
 0x53d   :  { %749 = vmatprep.mubr.f32.mxu0 %v2075_v0 }
 0x540   :  { %1569 = vmatmul.mubr.msk.f32.gmra.mxu0 %vm392_vm2, %v2250_v59 }
 0x541   :  { %1753 = vmatprep.mubr.msk.bf16.mxu0 %vm2076_vm0, %v2075_v0 }
 0x5fc   :  { %v745_v62 = vpop.f32.mrf.mxu0 }
 0x5fd   :  { %v756_v63 = vsub.f32 %v581_v39, %v745_v62 }
 0x5fe   :  { %v747_v2 = vpop.f32.mrf.mxu0 }
 0x5ff   :  { %v762_v3 = vmul.f32 %v761_v61, %v756_v63 }
 0x600   :  { %v751_v4 = vpop.f32.mrf.mxu0 }
 0x601   :  { %v764_v6 = vmul.f32 %v762_v3, %v747_v2  ;;  %v757_v8 = vsub.f32 %v586_v37, %v751_v4  ;;  %v816_v37 = vld [vmem:[#allocation10] sm:$0xff] }
 0x602   :  { %v753_v10 = vpop.f32.mrf.mxu0 }
 0x603   :  { %v763_v9 = vmul.f32 %v761_v61, %v757_v8  ;;  %v2297_v11 = vadd.f32 %v769_v7, %v764_v6  ;;  %v1001_v6 = vrot.slane %v2313_v46, %v2229_v41  ;;  %v1109_v41 = vld [vmem:[#allocation11 + $0x58] sm:$0xff] }
 0x605   :  { %v765_v13 = vmul.f32 %v763_v9, %v753_v10  ;;  %v772_v16 = vmax.f32 %v2297_v11, 0.0  ;;  %v1113_v9 = vld [vmem:[#allocation11 + $0x78] sm:$0xff]  ;;  %v1112_v10 = vld [vmem:[#allocation11 + $0x70] sm:$0xff] }
 0x607   :  { %v2299_v15 = vadd.f32 %v769_v7, %v765_v13  ;;  %v1111_v13 = vld [vmem:[#allocation11 + $0x68] sm:$0xff] }
 0x609   :  { %v773_v17 = vmax.f32 %v2299_v15, 0.0  ;;  %v1578_v15 = vld [vmem:[%s2434_s11] ss:$0 sm:$0xff] }
 0x60b   :  { %v774_v18 = vpack.c.bf16 %v773_v17, %v772_v16 }
 0x60d   :  { %1752 = vmatpush3.bf16.msra.mxu0 %v774_v18  ;;  %v1110_v18 = vld [vmem:[#allocation11 + $0x60] sm:$0xff] }
 0x60e   :  { %1757 = vmatprep.subr.mxu0 %v831_v19 }
 0x610   :  { %1754 = vmatmul.mubr.msk.bf16.vlgmr.msra.gmra.mxu0 %vm152_vm1, %v2189_v5  ;;  %v823_v5 = vld [vmem:[#allocation10 + $0x38] sm:$0xff] }
 0x611   :  { %1758 = vmatpush3.msra.mxu0 %v831_v19  ;;  %v1108_v19 = vld [vmem:[#allocation11 + $0x50] sm:$0xff] }
 0x612   :  { %1759 = vmatprep.subr.mxu0 %v830_v30 }
 0x613   :  { %1760 = vmatpush3.msra.mxu0 %v830_v30  ;;  %v1107_v30 = vld [vmem:[#allocation11 + $0x48] sm:$0xff] }
 0x614   :  { %1761 = vmatprep.subr.mxu0 %v829_v20 }
 0x615   :  { %1762 = vmatpush3.msra.mxu0 %v829_v20  ;;  %v1106_v20 = vld [vmem:[#allocation11 + $0x40] sm:$0xff] }
 0x616   :  { %1763 = vmatprep.subr.mxu0 %v828_v21 }
 0x617   :  { %1764 = vmatpush3.msra.mxu0 %v828_v21  ;;  %v1105_v21 = vld [vmem:[#allocation11 + $0x38] sm:$0xff] }
 0x618   :  { %1765 = vmatprep.subr.mxu0 %v827_v22 }
 0x619   :  { %1766 = vmatpush3.msra.mxu0 %v827_v22  ;;  %v1104_v22 = vld [vmem:[#allocation11 + $0x30] sm:$0xff] }
 0x61a   :  { %1767 = vmatprep.subr.mxu0 %v826_v23 }
 0x61b   :  { %1768 = vmatpush3.msra.mxu0 %v826_v23  ;;  %v1103_v23 = vld [vmem:[#allocation11 + $0x28] sm:$0xff] }
 0x61c   :  { %1769 = vmatprep.subr.mxu0 %v825_v24 }
 0x61d   :  { %1770 = vmatpush3.msra.mxu0 %v825_v24  ;;  %v1102_v24 = vld [vmem:[#allocation11 + $0x20] sm:$0xff] }
 0x61e   :  { %1771 = vmatprep.subr.mxu0 %v824_v25 }
 0x61f   :  { %1772 = vmatpush3.msra.mxu0 %v824_v25  ;;  %v1101_v25 = vld [vmem:[#allocation11 + $0x18] sm:$0xff] }
 0x620   :  { %1773 = vmatprep.subr.mxu0 %v823_v5 }
 0x621   :  { %1774 = vmatpush3.msra.mxu0 %v823_v5  ;;  %v1100_v5 = vld [vmem:[#allocation11 + $0x10] sm:$0xff] }
 0x622   :  { %1775 = vmatprep.subr.mxu0 %v822_v26 }
 0x623   :  { %1776 = vmatpush3.msra.mxu0 %v822_v26  ;;  %v1099_v26 = vld [vmem:[#allocation11 + $0x8] sm:$0xff] }
 0x624   :  { %1777 = vmatprep.subr.mxu0 %v821_v27 }
 0x625   :  { %1778 = vmatpush3.msra.mxu0 %v821_v27  ;;  %v1098_v27 = vld [vmem:[#allocation11] sm:$0xff] }
 0x626   :  { %1779 = vmatprep.subr.mxu0 %v820_v31 }
 0x627   :  { %1780 = vmatpush3.msra.mxu0 %v820_v31  ;;  %v1085_v31 = vrot.slane %v2313_v46, %v480_v12 }
 0x628   :  { %1781 = vmatprep.subr.mxu0 %v819_v32 }
 0x629   :  { %1782 = vmatpush3.msra.mxu0 %v819_v32 }
 0x62a   :  { %1783 = vmatprep.subr.mxu0 %v818_v35 }
 0x62b   :  { %1784 = vmatpush3.msra.mxu0 %v818_v35 }
 0x62c   :  { %1785 = vmatprep.subr.mxu0 %v817_v36 }
 0x62d   :  { %1786 = vmatpush3.msra.mxu0 %v817_v36 }
 0x62e   :  { %1787 = vmatprep.subr.mxu0 %v816_v37 }
 0x62f   :  { %1788 = vmatpush3.msra.mxu0 %v816_v37 }
 0x6d0   :  { %v809_v33 = vpop.f32.mrf.mxu0 }
 0x6d1   :  { %1789 = vmatprep.mubr.f32.mxu0 %v809_v33  ;;  %v1093_v33 = vrot.slane %v2313_v46, %v488_v14  ;;  %v1117_v14 = vrot.slane %v2313_v46, %v512_v34  ;;  %v1271_v34 = vrot.slane %v2333_v54, %v2273_v45  ;;  %v1464_v54 = vld [vmem:[#allocation13 + $0x70] sm:$0xff] }
 0x6d2   :  { %v1755_v39 = vpop.f32.mrf.mxu0 }
 0x6d4   :  { %v812_v43 = vpop.f32.mrf.mxu0 }
 0x6d5   :  { %1790 = vmatmul.mubr.f32.vlgmr.msra.gmra.mxu0 %v812_v43 }
 0x6d6   :  { %v1756_v44 = vpop.f32.mrf.mxu0  ;;  %1259 = vmatprep.mubr.f32.mxu0 %v2075_v0 }
 0x795   :  { %v1791_v48 = vpop.f32.mrf.mxu0 }
 0x796   :  { %v2318_v49 = vadd.f32 %v1791_v48, %v835_v47 }
 0x797   :  { %v902_v50 = vpop.f32.mrf.mxu0 }
 0x798   :  { %v2320_v51 = vadd.f32 %v902_v50, %v835_v47  ;;  %v912_v52 = vmul.f32 %v2318_v49, %v2318_v49 }
 0x79a   :  { %941 = vmatprep.subr.mxu1 %v912_v52  ;;  %v911_v53 = vmul.f32 %v2320_v51, %v2320_v51 }
 0x79b   :  { %942 = vmatpush1.msra.mxu1 %v2318_v49 }
 0x79c   :  { %943 = vmatprep.subr.mxu1 %v911_v53 }
 0x79d   :  { %944 = vmatpush1.msra.mxu1 %v2320_v51 }
 0x79e   :  { %1571 = vmatmul.mubr.msk.f32.vlgmr.msra.gmra.mxu1 %vm152_vm1, %v2218_v38 }
 0x79f   :  { %1067 = vmatprep.mubr.f32.mxu1 %v2075_v0 }
 0x85e   :  { %v979_v57 = vpop.f32.mrf.mxu1 }
 0x85f   :  { %v984_v58 = vmul.f32 %v979_v57, %v2231_v42 }
 0x860   :  { %v981_v60 = vpop.f32.mrf.mxu1 }
 0x861   :  { %v992_v61 = vmul.f32 %v991_v55, %v984_v58  ;;  %v985_v62 = vmul.f32 %v981_v60, %v2231_v42  ;;  %v1002_v8 = vmul.f32 %v1001_v6, %v984_v58 }
 0x863   :  { %v993_v63 = vmul.f32 %v992_v61, %v984_v58 }
 0x865   :  { %v994_v2 = vsub.f32 %v985_v62, %v993_v63 }
 0x867   :  { %v995_v3 = vmax.f32 %v994_v2, 0.0 }
 0x869   :  { %v996_v4 = vadd.f32 1e-06, %v995_v3 }
 0x86b   :  { %1890 = vrsqrt.f32 %v996_v4 }
 0x878   :  { %v1891_v7 = vpop.eup %1890 }
 0x879   :  { %1033 = vmatprep.subr.mxu1 %v1891_v7 }
 0x87a   :  { %1034 = vmatpush1.msra.mxu1 %v1002_v8 }
 0x87b   :  { %1572 = vmatmul.mubr.msk.f32.vlgmr.msra.gmra.mxu1 %vm392_vm2, %v2242_v56  ;;  %1792 = vmatprep.subr.mxu1 %v1113_v9 }
 0x87c   :  { %1073 = vmatprep.mubr.f32.mxu1 %v2075_v0  ;;  %1793 = vmatpush3.msra.mxu1 %v1113_v9  ;;  %v1281_v9 = vrot.slane %v2313_v46, %v2273_v45  ;;  %v1463_v45 = vld [vmem:[#allocation13 + $0x68] sm:$0xff] }
 0x87d   :  { %1794 = vmatprep.subr.mxu1 %v1112_v10 }
 0x87e   :  { %1795 = vmatpush3.msra.mxu1 %v1112_v10 }
 0x87f   :  { %1573 = vmatmul.mubr.msk.f32.gmra.mxu1 %vm392_vm2, %v2250_v59  ;;  %1796 = vmatprep.subr.mxu1 %v1111_v13 }
 0x880   :  { %1797 = vmatpush3.msra.mxu1 %v1111_v13 }
 0x881   :  { %1798 = vmatprep.subr.mxu1 %v1110_v18 }
 0x882   :  { %1799 = vmatpush3.msra.mxu1 %v1110_v18  ;;  %v1461_v18 = vld [vmem:[#allocation13 + $0x58] sm:$0xff] }
 0x883   :  { %1800 = vmatprep.subr.mxu1 %v1109_v41 }
 0x884   :  { %1801 = vmatpush3.msra.mxu1 %v1109_v41  ;;  %v1459_v41 = vld [vmem:[#allocation13 + $0x48] sm:$0xff] }
 0x885   :  { %1802 = vmatprep.subr.mxu1 %v1108_v19 }
 0x886   :  { %1803 = vmatpush3.msra.mxu1 %v1108_v19  ;;  %v1458_v19 = vld [vmem:[#allocation13 + $0x40] sm:$0xff] }
 0x887   :  { %1804 = vmatprep.subr.mxu1 %v1107_v30 }
 0x888   :  { %1805 = vmatpush3.msra.mxu1 %v1107_v30  ;;  %v1457_v30 = vld [vmem:[#allocation13 + $0x38] sm:$0xff] }
 0x889   :  { %1806 = vmatprep.subr.mxu1 %v1106_v20 }
 0x88a   :  { %1807 = vmatpush3.msra.mxu1 %v1106_v20  ;;  %v1456_v20 = vld [vmem:[#allocation13 + $0x30] sm:$0xff] }
 0x88b   :  { %1808 = vmatprep.subr.mxu1 %v1105_v21 }
 0x88c   :  { %1809 = vmatpush3.msra.mxu1 %v1105_v21  ;;  %v1455_v21 = vld [vmem:[#allocation13 + $0x28] sm:$0xff] }
 0x88d   :  { %1810 = vmatprep.subr.mxu1 %v1104_v22 }
 0x88e   :  { %1811 = vmatpush3.msra.mxu1 %v1104_v22  ;;  %v1454_v22 = vld [vmem:[#allocation13 + $0x20] sm:$0xff] }
 0x88f   :  { %1812 = vmatprep.subr.mxu1 %v1103_v23 }
 0x890   :  { %1813 = vmatpush3.msra.mxu1 %v1103_v23  ;;  %v1453_v23 = vld [vmem:[#allocation13 + $0x18] sm:$0xff] }
 0x891   :  { %1814 = vmatprep.subr.mxu1 %v1102_v24 }
 0x892   :  { %1815 = vmatpush3.msra.mxu1 %v1102_v24  ;;  %v1452_v24 = vld [vmem:[#allocation13 + $0x10] sm:$0xff] }
 0x893   :  { %1816 = vmatprep.subr.mxu1 %v1101_v25 }
 0x894   :  { %1817 = vmatpush3.msra.mxu1 %v1101_v25  ;;  %v1451_v25 = vld [vmem:[#allocation13 + $0x8] sm:$0xff] }
 0x895   :  { %1818 = vmatprep.subr.mxu1 %v1100_v5 }
 0x896   :  { %1819 = vmatpush3.msra.mxu1 %v1100_v5  ;;  %v1365_v5 = vrot.slane %v2313_v46, %v760_v40 }
 0x897   :  { %1820 = vmatprep.subr.mxu1 %v1099_v26 }
 0x898   :  { %1821 = vmatpush3.msra.mxu1 %v1099_v26 }
 0x899   :  { %1822 = vmatprep.subr.mxu1 %v1098_v27 }
 0x89a   :  { %1823 = vmatpush3.msra.mxu1 %v1098_v27 }
 0x89b   :  { %1834 = vmatprep.subr.mxu1 %v2075_v0 }
 0x93b   :  { %v1069_v32 = vpop.f32.mrf.mxu1 }
 0x93c   :  { %v1080_v35 = vsub.f32 %v2320_v51, %v1069_v32 }
 0x93d   :  { %v1071_v36 = vpop.f32.mrf.mxu1 }
 0x93e   :  { %v1086_v37 = vmul.f32 %v1085_v31, %v1080_v35 }
 0x93f   :  { %v1075_v39 = vpop.f32.mrf.mxu1 }
 0x940   :  { %v1088_v43 = vmul.f32 %v1086_v37, %v1071_v36  ;;  %v1081_v44 = vsub.f32 %v2318_v49, %v1075_v39  ;;  %v1373_v37 = vrot.slane %v2313_v46, %v768_v1 }
 0x941   :  { %v1077_v50 = vpop.f32.mrf.mxu1 }
 0x942   :  { %v1094_v47 = vadd.f32 %v1093_v33, %v1088_v43  ;;  %v1087_v48 = vmul.f32 %v1085_v31, %v1081_v44 }
 0x944   :  { %v1096_v52 = vmax.f32 %v1094_v47, 0.0  ;;  %v1089_v53 = vmul.f32 %v1087_v48, %v1077_v50 }
 0x946   :  { %v1095_v29 = vadd.f32 %v1093_v33, %v1089_v53  ;;  %1824 = vmatprep.mubr.f32.mxu1 %v1096_v52 }
 0x948   :  { %v1097_v12 = vmax.f32 %v1095_v29, 0.0 }
 0x94a   :  { %1825 = vmatmul.mubr.f32.vlgmr.msra.gmra.mxu1 %v1097_v12 }
 0x94b   :  { %1866 = vmatprep.mubr.msk.f32.mxu1 %vm2076_vm0, %v2075_v0 }
 0xa0a   :  { %v1826_v51 = vpop.f32.mrf.mxu1 }
 0xa0b   :  { %v2360_v55 = vadd.f32 %v1826_v51, %v1117_v14 }
 0xa0c   :  { %v1184_v49 = vpop.f32.mrf.mxu1 }
 0xa0d   :  { %v2362_v57 = vadd.f32 %v1184_v49, %v1117_v14  ;;  %v1194_v58 = vmul.f32 %v2360_v55, %v2360_v55 }
 0xa0f   :  { %1223 = vmatprep.subr.mxu0 %v1194_v58  ;;  %v1193_v60 = vmul.f32 %v2362_v57, %v2362_v57 }
 0xa10   :  { %1224 = vmatpush1.msra.mxu0 %v2360_v55 }
 0xa11   :  { %1225 = vmatprep.subr.mxu0 %v1193_v60 }
 0xa12   :  { %1226 = vmatpush1.msra.mxu0 %v2362_v57 }
 0xa13   :  { %1574 = vmatmul.mubr.msk.f32.vlgmr.msra.gmra.mxu0 %vm152_vm1, %v2218_v38 }
 0xa14   :  { %1347 = vmatprep.mubr.f32.mxu0 %v2075_v0 }
 0xad3   :  { %v1261_v61 = vpop.f32.mrf.mxu0 }
 0xad4   :  { %v1266_v62 = vmul.f32 %v1261_v61, %v2231_v42 }
 0xad5   :  { %v1263_v63 = vpop.f32.mrf.mxu0 }
 0xad6   :  { %v1272_v2 = vmul.f32 %v1271_v34, %v1266_v62  ;;  %v1267_v3 = vmul.f32 %v1263_v63, %v2231_v42  ;;  %v1282_v13 = vmul.f32 %v1281_v9, %v1266_v62  ;;  %v1465_v42 = vld [vmem:[#allocation13 + $0x78] sm:$0xff] }
 0xad7   :  { %1835 = vmatpush3.msra.mxu1 %v1465_v42 }
 0xad8   :  { %v1273_v4 = vmul.f32 %v1272_v2, %v1266_v62  ;;  %1836 = vmatprep.subr.mxu1 %v2075_v0 }
 0xad9   :  { %1837 = vmatpush3.msra.mxu1 %v1464_v54 }
 0xada   :  { %v1274_v6 = vsub.f32 %v1267_v3, %v1273_v4  ;;  %1838 = vmatprep.subr.mxu1 %v2075_v0 }
 0xadb   :  { %1839 = vmatpush3.msra.mxu1 %v1463_v45 }
 0xadc   :  { %v1275_v7 = vmax.f32 %v1274_v6, 0.0  ;;  %1840 = vmatprep.subr.mxu1 %v2075_v0 }
 0xade   :  { %v1276_v8 = vadd.f32 1e-06, %v1275_v7 }
 0xae0   :  { %1892 = vrsqrt.f32 %v1276_v8 }
 0xaed   :  { %v1893_v10 = vpop.eup %1892 }
 0xaee   :  { %1313 = vmatprep.subr.mxu0 %v1893_v10 }
 0xaef   :  { %1314 = vmatpush1.msra.mxu0 %v1282_v13 }
 0xaf0   :  { %1575 = vmatmul.mubr.msk.f32.vlgmr.msra.gmra.mxu0 %vm392_vm2, %v2242_v56  ;;  %1827 = vmatprep.subr.mxu0 %v2075_v0  ;;  %v1462_v56 = vld [vmem:[#allocation13 + $0x60] sm:$0xff] }
 0xaf1   :  { %1353 = vmatprep.mubr.f32.mxu0 %v2075_v0  ;;  %1841 = vmatpush3.msra.mxu1 %v1462_v56 }
 0xaf2   :  { %1842 = vmatprep.subr.mxu1 %v2075_v0 }
 0xaf3   :  { %1843 = vmatpush3.msra.mxu1 %v1461_v18 }
 0xaf4   :  { %1576 = vmatmul.mubr.msk.f32.gmra.mxu0 %vm392_vm2, %v2250_v59  ;;  %v1460_v59 = vld [vmem:[#allocation13 + $0x50] sm:$0xff]  ;;  %1844 = vmatprep.subr.mxu1 %v2075_v0 }
 0xaf5   :  { %1831 = vmatprep.mubr.msk.f32.mxu0 %vm2076_vm0, %v2075_v0  ;;  %1845 = vmatpush3.msra.mxu1 %v1460_v59 }
 0xaf6   :  { %1846 = vmatprep.subr.mxu1 %v2075_v0 }
 0xaf7   :  { %1847 = vmatpush3.msra.mxu1 %v1459_v41 }
 0xaf8   :  { %1848 = vmatprep.subr.mxu1 %v2075_v0 }
 0xaf9   :  { %1849 = vmatpush3.msra.mxu1 %v1458_v19 }
 0xafa   :  { %1850 = vmatprep.subr.mxu1 %v2075_v0 }
 0xafb   :  { %1851 = vmatpush3.msra.mxu1 %v1457_v30 }
 0xafc   :  { %1852 = vmatprep.subr.mxu1 %v2075_v0 }
 0xafd   :  { %1853 = vmatpush3.msra.mxu1 %v1456_v20 }
 0xafe   :  { %1854 = vmatprep.subr.mxu1 %v2075_v0 }
 0xaff   :  { %1855 = vmatpush3.msra.mxu1 %v1455_v21 }
 0xb00   :  { %1856 = vmatprep.subr.mxu1 %v2075_v0 }
 0xb01   :  { %1857 = vmatpush3.msra.mxu1 %v1454_v22 }
 0xb02   :  { %1858 = vmatprep.subr.mxu1 %v2075_v0 }
 0xb03   :  { %1859 = vmatpush3.msra.mxu1 %v1453_v23 }
 0xb04   :  { %1860 = vmatprep.subr.mxu1 %v2075_v0 }
 0xb05   :  { %1861 = vmatpush3.msra.mxu1 %v1452_v24 }
 0xb06   :  { %1862 = vmatprep.subr.mxu1 %v2075_v0 }
 0xb07   :  { %1863 = vmatpush3.msra.mxu1 %v1451_v25 }
 0xb08   :  { %1864 = vmatprep.subr.mxu1 %v2075_v0 }
 0xb09   :  { %1865 = vmatpush3.msra.mxu1 %v1450_v28 }
 0xbb0   :  { %v1349_v26 = vpop.f32.mrf.mxu0 }
 0xbb1   :  { %v1360_v27 = vsub.f32 %v2362_v57, %v1349_v26 }
 0xbb2   :  { %v1351_v31 = vpop.f32.mrf.mxu0 }
 0xbb3   :  { %v1366_v32 = vmul.f32 %v1365_v5, %v1360_v27 }
 0xbb4   :  { %v1355_v35 = vpop.f32.mrf.mxu0 }
 0xbb5   :  { %v1368_v36 = vmul.f32 %v1366_v32, %v1351_v31  ;;  %v1361_v33 = vsub.f32 %v2360_v55, %v1355_v35 }
 0xbb6   :  { %v1357_v43 = vpop.f32.mrf.mxu0 }
 0xbb7   :  { %v1367_v39 = vmul.f32 %v1365_v5, %v1361_v33  ;;  %v1374_v44 = vadd.f32 %v1373_v37, %v1368_v36 }
 0xbb9   :  { %v1369_v47 = vmul.f32 %v1367_v39, %v1357_v43  ;;  %v1376_v50 = vmax.f32 %v1374_v44, 0.0 }
 0xbbb   :  { %v1375_v48 = vadd.f32 %v1373_v37, %v1369_v47  ;;  %v1378_v53 = vadd.f32 %v1376_v50, %v772_v16 }
 0xbbd   :  { %v1377_v40 = vmax.f32 %v1375_v48, 0.0 }
 0xbbf   :  { %v1379_v52 = vadd.f32 %v1377_v40, %v773_v17 }
 0xbc1   :  { %1828 = vmatpush3.msra.mxu0 %v1379_v52 }
 0xbc2   :  { %1829 = vmatprep.subr.mxu0 %v2075_v0 }
 0xbc3   :  { %1830 = vmatpush3.msra.mxu0 %v1378_v53 }
 0xbc4   :  { %1832 = vmatmul.mubr.msk.f32.vlgmr.msra.gmra.mxu0 %vm152_vm1, %v2218_v38 }
 0xc84   :  { %v1446_v1 = vpop.f32.mrf.mxu0 }
 0xc85   :  { %1867 = vmatmul.mubr.f32.vlgmr.msra.gmra.mxu1 %v1446_v1 }
 0xc86   :  { %v1833_v46 = vpop.f32.mrf.mxu0 }
 0xd45   :  { %v1539_v11 = vpop.f32.mrf.mxu1 }
 0xd46   :  { %v1540_v16 = vadd.f32 %v1578_v15, %v1539_v11 }
 0xd47   :  { %v1868_v17 = vpop.f32.mrf.mxu1 }
 0xd48   :  { %1543 = vst [vmem:[#allocation14] sm:$0xff] %v1540_v16 }
 0xd49   :  { %2045 = shalt.err (!%p2042_p11)
}
 0xd4a   :  { %1553 = dma.vmem_to_hbm [thread:$0]  %s1551_s9, 128, %s2435_s12, [#allocation4]  }
 0xd4b   :  { %2062 = dma.done.wait [#allocation4], 128  }
 0xd4c   :  { %2063 = vsyncadd [#allocation4], 4294967168 }
 0xd4d   :  { %1557 = vsyncpa [#allocation3], 1 }
 0xd4e   :  { %1558 = vsyncpa [#allocation6], 1 }
 0xd4f   :  { %1559 = vsyncpa [#allocation9], 1 }
 0xd50   :  { %1560 = vsyncpa [#allocation12], 1 }
 0xd51   :  { %1561 = vsyncpa [#allocation4], 1 }

</bundles_post_ra>
